<compile_context>
chip_gen: v6e
topology: v6e:2x2x1
jax: 0.10.0
libtpu: 0.0.40
codegen_flags: <defaults>
</compile_context>

<pallas_src>
import jax
import jax.numpy as jnp
import numpy as np
from jax.experimental import pallas as pl
from jax.experimental.pallas import tpu as pltpu


# ----------------------------- fused Pallas kernel ----------------------------

def _fused_cnn_kernel(xq_ref, y_ref,
                      r1_ref, w1_ref, b1_ref,
                      r2_ref, w2_ref, b2_ref,
                      tsel_ref, wf1_ref, bf1_ref,
                      w2x_ref, w2y_ref, bf2_ref,
                      w3_ref, bf3_ref,
                      w4_ref, bf4_ref,
                      o_ref):
    f32 = jnp.float32
    xq = xq_ref[...]                                      # (B*H*W, C), channels-last

    # ---- Conv2d(3, 32, k=3, s=2) + ReLU  (in-kernel im2col via selection matmuls)
    acc1 = None
    for k in range(r1_ref.shape[0]):                      # 9 kernel positions, unrolled
        picked = jnp.dot(r1_ref[k], xq, preferred_element_type=f32)       # (B*S1, C)
        term = jnp.dot(picked, w1_ref[k], preferred_element_type=f32)     # (B*S1, 32)
        acc1 = term if acc1 is None else acc1 + term
    h1 = jnp.maximum(acc1 + b1_ref[...], 0.0)             # (B*S1, 32)

    # ---- Conv2d(32, 64, k=2, s=1) + ReLU ----------------------------------------
    acc2 = None
    for k in range(r2_ref.shape[0]):                      # 4 kernel positions
        picked = jnp.dot(r2_ref[k], h1, preferred_element_type=f32)       # (B*S2, 32)
        term = jnp.dot(picked, w2_ref[k], preferred_element_type=f32)     # (B*S2, 64)
        acc2 = term if acc2 is None else acc2 + term
    h2 = jnp.maximum(acc2 + b2_ref[...], 0.0)             # (B*S2, 64)

    # TODO(synk): nn.Dropout(p=0.5) after Flatten is identity in eval mode.

    # ---- Flatten + Linear(64*S2, 32) + ReLU -------------------------------------
    # PyTorch flattens in (channel, spatial) order; that permutation is folded into
    # wf1 (one (64, 32) weight slice per spatial position) — no in-kernel transpose.
    acc3 = None
    for s in range(tsel_ref.shape[0]):                    # S2 spatial positions
        rows = jnp.dot(tsel_ref[s], h2, preferred_element_type=f32)       # (B, 64)
        term = jnp.dot(rows, wf1_ref[s], preferred_element_type=f32)      # (B, 32)
        acc3 = term if acc3 is None else acc3 + term
    h3 = jnp.maximum(acc3 + bf1_ref[...], 0.0)            # (B, 32)

    # ---- cat((x, y), -1) -> Linear(36, 32) + ReLU (concat folded into weights) --
    h4 = jnp.maximum(
        jnp.dot(h3, w2x_ref[...], preferred_element_type=f32)
        + jnp.dot(y_ref[...], w2y_ref[...], preferred_element_type=f32)
        + bf2_ref[...], 0.0)

    # TODO(synk): nn.Dropout(p=0.5) between fc2 and fc3 is identity in eval mode.

    # ---- Linear(32, 12) + ReLU -> Linear(12, n_actions) -------------------------
    h5 = jnp.maximum(jnp.dot(h4, w3_ref[...], preferred_element_type=f32)
                     + bf3_ref[...], 0.0)
    o_ref[...] = (jnp.dot(h5, w4_ref[...], preferred_element_type=f32)
                  + bf4_ref[...]).astype(o_ref.dtype)


# ------------------------- one-time parameter preparation ---------------------

def prepare_inference(params, batch, state_shape):
    """Fold all weight layout work + build the in-kernel im2col selection constants.

    Called once; returns a tuple of device arrays in kernel-argument order.
    Selection matrices are block-diagonal over batch (fine for small DQN batches).
    """
    C, H, W = state_shape
    OH1, OW1 = (H - 3) // 2 + 1, (W - 3) // 2 + 1
    OH2, OW2 = OH1 - 1, OW1 - 1
    S0, S1, S2 = H * W, OH1 * OW1, OH2 * OW2
    B = batch
    eye_b = np.eye(B, dtype=np.float32)

    # conv1 (k=3, s=2): row (b, oh, ow) of R1[k] picks input pixel (2*oh+kh, 2*ow+kw).
    r1 = np.zeros((9, S1, S0), np.float32)
    for kh in range(3):
        for kw in range(3):
            for oh in range(OH1):
                for ow in range(OW1):
                    r1[kh * 3 + kw, oh * OW1 + ow, (2 * oh + kh) * W + (2 * ow + kw)] = 1.0
    r1 = np.stack([np.kron(eye_b, r1[k]) for k in range(9)])          # (9, B*S1, B*S0)

    # conv2 (k=2, s=1): row (b, oh2, ow2) of R2[k] picks conv1 output (oh2+kh, ow2+kw).
    r2 = np.zeros((4, S2, S1), np.float32)
    for kh in range(2):
        for kw in range(2):
            for oh in range(OH2):
                for ow in range(OW2):
                    r2[kh * 2 + kw, oh * OW2 + ow, (oh + kh) * OW1 + (ow + kw)] = 1.0
    r2 = np.stack([np.kron(eye_b, r2[k]) for k in range(4)])          # (4, B*S2, B*S1)

    # fc1 row-select: T[s] picks row (b*S2 + s) of the conv2 activation matrix.
    tsel = np.zeros((S2, B, B * S2), np.float32)
    for s in range(S2):
        for b in range(B):
            tsel[s, b, b * S2 + s] = 1.0

    w1 = np.asarray(params["w_conv1"])            # (32, C, 3, 3)  (O, C, kh, kw)
    w2 = np.asarray(params["w_conv2"])            # (64, 32, 2, 2)
    wf1 = np.asarray(params["w_fc1"])             # (32, 64*S2), PyTorch flatten order (c, s)
    wf2 = np.asarray(params["w_fc2"])             # (32, 36)
    wf3 = np.asarray(params["w_fc3"])             # (12, 32)
    wf4 = np.asarray(params["w_fc4"])             # (A, 12)

    prep = (
        r1,
        w1.transpose(2, 3, 1, 0).reshape(9, C, 32),           # (9, C, 32)   [k, c, o]
        np.asarray(params["b_conv1"]).reshape(1, 32),
        r2,
        w2.transpose(2, 3, 1, 0).reshape(4, 32, 64),           # (4, 32, 64)  [k, c, o]
        np.asarray(params["b_conv2"]).reshape(1, 64),
        tsel,
        wf1.reshape(32, 64, S2).transpose(2, 1, 0),            # (S2, 64, 32) [s, c, o]
        np.asarray(params["b_fc1"]).reshape(1, 32),
        wf2[:, :32].T, wf2[:, 32:].T,                          # concat fold: x-part / y-part
        np.asarray(params["b_fc2"]).reshape(1, 32),
        wf3.T, np.asarray(params["b_fc3"]).reshape(1, -1),
        wf4.T, np.asarray(params["b_fc4"]).reshape(1, -1),
    )
    return tuple(jnp.asarray(a) for a in prep)


# --------------------------------- forward ------------------------------------

@jax.jit
def cnn_version2_forward(prep, x, y):
    B, C, H, W = x.shape
    n_actions = prep[-1].shape[1]
    # Single channels-last layout transform of the raw input; everything else
    # (both convs, flatten, full MLP head) runs inside one Pallas kernel.
    xq = jnp.transpose(x, (0, 2, 3, 1)).reshape(B * H * W, C)
    args = (xq, y) + tuple(prep)
    return pl.pallas_call(
        _fused_cnn_kernel,
        out_shape=jax.ShapeDtypeStruct((B, n_actions), jnp.float32),
        in_specs=[pl.BlockSpec(memory_space=pltpu.MemorySpace.VMEM)] * len(args),
        out_specs=pl.BlockSpec(memory_space=pltpu.MemorySpace.VMEM),
    )(*args)


# --------------------------------- test glue -----------------------------------

def init_params(key, state_shape, n_actions):
    h, w = state_shape[1], state_shape[2]
    flat = 64 * int((h - 3) / 2) * int((w - 3) / 2)
    ks = jax.random.split(key, 12)

    def rn(k, shape, scale):
        return scale * jax.random.normal(k, shape, jnp.float32)

    return {
        "w_conv1": rn(ks[0], (32, 3, 3, 3), 0.10), "b_conv1": rn(ks[1], (32,), 0.10),
        "w_conv2": rn(ks[2], (64, 32, 2, 2), 0.05), "b_conv2": rn(ks[3], (64,), 0.10),
        "w_fc1": rn(ks[4], (32, flat), 0.05),       "b_fc1": rn(ks[5], (32,), 0.10),
        "w_fc2": rn(ks[6], (32, 32 + 4), 0.10),     "b_fc2": rn(ks[7], (32,), 0.10),
        "w_fc3": rn(ks[8], (12, 32), 0.10),         "b_fc3": rn(ks[9], (12,), 0.10),
        "w_fc4": rn(ks[10], (n_actions, 12), 0.10), "b_fc4": rn(ks[11], (n_actions,), 0.10),
    }


def reference_forward(params, x, y):
    """Pure-JAX reference mirroring the PyTorch forward (eval mode)."""
    h = jax.lax.conv_general_dilated(x, params["w_conv1"], (2, 2), "VALID",
                                     dimension_numbers=("NCHW", "OIHW", "NCHW"))
    h = jax.nn.relu(h + params["b_conv1"][None, :, None, None])
    h = jax.lax.conv_general_dilated(h, params["w_conv2"], (1, 1), "VALID",
                                     dimension_numbers=("NCHW", "OIHW", "NCHW"))
    h = jax.nn.relu(h + params["b_conv2"][None, :, None, None])
    h = h.reshape(h.shape[0], -1)
    h = jax.nn.relu(h @ params["w_fc1"].T + params["b_fc1"])
    c = jnp.concatenate([h, y], axis=-1)
    h = jax.nn.relu(c @ params["w_fc2"].T + params["b_fc2"])
    h = jax.nn.relu(h @ params["w_fc3"].T + params["b_fc3"])
    return h @ params["w_fc4"].T + params["b_fc4"]


if __name__ == "__main__":
    state_shape = (3, 9, 9)     # (C, H, W) neighborhood observation
    n_actions = 5
    batch = 2

    key = jax.random.PRNGKey(0)
    k_params, k_x, k_y = jax.random.split(key, 3)
    params = init_params(k_params, state_shape, n_actions)
    x = jax.random.uniform(k_x, (batch,) + state_shape, jnp.float32)
    y = jax.random.uniform(k_y, (batch, 4), jnp.float32)

    prep = prepare_inference(params, batch, state_shape)      # one-time weight/constant prep
    out = jax.block_until_ready(cnn_version2_forward(prep, x, y))

    ref = jax.block_until_ready(reference_forward(params, x, y))
    np.testing.assert_allclose(np.asarray(out), np.asarray(ref), rtol=5e-2, atol=5e-2)
    assert out.shape == (batch, n_actions) and out.dtype == jnp.float32

    print("KERNEL_OK")
</pallas_src>

<mosaic_0001>
module attributes {stable_mosaic.version = 11 : i64} {
  func.func @_fused_cnn_kernel(%arg0: memref<162x3xf32, #tpu.memory_space<vmem>>, %arg1: memref<2x4xf32, #tpu.memory_space<vmem>>, %arg2: memref<9x32x162xf32, #tpu.memory_space<vmem>>, %arg3: memref<9x3x32xf32, #tpu.memory_space<vmem>>, %arg4: memref<1x32xf32, #tpu.memory_space<vmem>>, %arg5: memref<4x18x32xf32, #tpu.memory_space<vmem>>, %arg6: memref<4x32x64xf32, #tpu.memory_space<vmem>>, %arg7: memref<1x64xf32, #tpu.memory_space<vmem>>, %arg8: memref<9x2x18xf32, #tpu.memory_space<vmem>>, %arg9: memref<9x64x32xf32, #tpu.memory_space<vmem>>, %arg10: memref<1x32xf32, #tpu.memory_space<vmem>>, %arg11: memref<32x32xf32, #tpu.memory_space<vmem>>, %arg12: memref<4x32xf32, #tpu.memory_space<vmem>>, %arg13: memref<1x32xf32, #tpu.memory_space<vmem>>, %arg14: memref<32x12xf32, #tpu.memory_space<vmem>>, %arg15: memref<1x12xf32, #tpu.memory_space<vmem>>, %arg16: memref<12x5xf32, #tpu.memory_space<vmem>>, %arg17: memref<1x5xf32, #tpu.memory_space<vmem>>, %arg18: memref<2x5xf32, #tpu.memory_space<vmem>>) attributes {dimension_semantics = [], scalar_prefetch = 0 : i64, scratch_operands = 0 : i64, tpu.core_type = #tpu.core_type<tc>} {
    %c0 = arith.constant 0 : index
    %c0_0 = arith.constant 0 : index
    %0 = vector.load %arg0[%c0, %c0_0] : memref<162x3xf32, #tpu.memory_space<vmem>>, vector<162x3xf32>
    %c0_1 = arith.constant 0 : index
    %c0_2 = arith.constant 0 : index
    %c0_3 = arith.constant 0 : index
    %1 = vector.load %arg2[%c0_1, %c0_2, %c0_3] : memref<9x32x162xf32, #tpu.memory_space<vmem>>, vector<1x32x162xf32>
    %2 = vector.shape_cast %1 : vector<1x32x162xf32> to vector<32x162xf32>
    %cst = arith.constant dense<0.000000e+00> : vector<32x3xf32>
    %3 = tpu.matmul %2, %0, %cst {dimension_numbers = #tpu.dot_dimension_numbers<[1], [0], [0], [1], [0, 0, 1, 1], [], []>} : vector<32x162xf32>, vector<162x3xf32>, vector<32x3xf32> -> vector<32x3xf32>
    %c0_4 = arith.constant 0 : index
    %c0_5 = arith.constant 0 : index
    %c0_6 = arith.constant 0 : index
    %4 = vector.load %arg3[%c0_4, %c0_5, %c0_6] : memref<9x3x32xf32, #tpu.memory_space<vmem>>, vector<1x3x32xf32>
    %5 = vector.shape_cast %4 : vector<1x3x32xf32> to vector<3x32xf32>
    %cst_7 = arith.constant dense<0.000000e+00> : vector<32x32xf32>
    %6 = tpu.matmul %3, %5, %cst_7 {dimension_numbers = #tpu.dot_dimension_numbers<[1], [0], [0], [1], [0, 0, 1, 1], [], []>} : vector<32x3xf32>, vector<3x32xf32>, vector<32x32xf32> -> vector<32x32xf32>
    %c1 = arith.constant 1 : index
    %c0_8 = arith.constant 0 : index
    %c0_9 = arith.constant 0 : index
    %7 = vector.load %arg2[%c1, %c0_8, %c0_9] : memref<9x32x162xf32, #tpu.memory_space<vmem>>, vector<1x32x162xf32>
    %8 = vector.shape_cast %7 : vector<1x32x162xf32> to vector<32x162xf32>
    %cst_10 = arith.constant dense<0.000000e+00> : vector<32x3xf32>
    %9 = tpu.matmul %8, %0, %cst_10 {dimension_numbers = #tpu.dot_dimension_numbers<[1], [0], [0], [1], [0, 0, 1, 1], [], []>} : vector<32x162xf32>, vector<162x3xf32>, vector<32x3xf32> -> vector<32x3xf32>
    %c1_11 = arith.constant 1 : index
    %c0_12 = arith.constant 0 : index
    %c0_13 = arith.constant 0 : index
    %10 = vector.load %arg3[%c1_11, %c0_12, %c0_13] : memref<9x3x32xf32, #tpu.memory_space<vmem>>, vector<1x3x32xf32>
    %11 = vector.shape_cast %10 : vector<1x3x32xf32> to vector<3x32xf32>
    %cst_14 = arith.constant dense<0.000000e+00> : vector<32x32xf32>
    %12 = tpu.matmul %9, %11, %cst_14 {dimension_numbers = #tpu.dot_dimension_numbers<[1], [0], [0], [1], [0, 0, 1, 1], [], []>} : vector<32x3xf32>, vector<3x32xf32>, vector<32x32xf32> -> vector<32x32xf32>
    %13 = arith.addf %6, %12 : vector<32x32xf32>
    %c2 = arith.constant 2 : index
    %c0_15 = arith.constant 0 : index
    %c0_16 = arith.constant 0 : index
    %14 = vector.load %arg2[%c2, %c0_15, %c0_16] : memref<9x32x162xf32, #tpu.memory_space<vmem>>, vector<1x32x162xf32>
    %15 = vector.shape_cast %14 : vector<1x32x162xf32> to vector<32x162xf32>
    %cst_17 = arith.constant dense<0.000000e+00> : vector<32x3xf32>
    %16 = tpu.matmul %15, %0, %cst_17 {dimension_numbers = #tpu.dot_dimension_numbers<[1], [0], [0], [1], [0, 0, 1, 1], [], []>} : vector<32x162xf32>, vector<162x3xf32>, vector<32x3xf32> -> vector<32x3xf32>
    %c2_18 = arith.constant 2 : index
    %c0_19 = arith.constant 0 : index
    %c0_20 = arith.constant 0 : index
    %17 = vector.load %arg3[%c2_18, %c0_19, %c0_20] : memref<9x3x32xf32, #tpu.memory_space<vmem>>, vector<1x3x32xf32>
    %18 = vector.shape_cast %17 : vector<1x3x32xf32> to vector<3x32xf32>
    %cst_21 = arith.constant dense<0.000000e+00> : vector<32x32xf32>
    %19 = tpu.matmul %16, %18, %cst_21 {dimension_numbers = #tpu.dot_dimension_numbers<[1], [0], [0], [1], [0, 0, 1, 1], [], []>} : vector<32x3xf32>, vector<3x32xf32>, vector<32x32xf32> -> vector<32x32xf32>
    %20 = arith.addf %13, %19 : vector<32x32xf32>
    %c3 = arith.constant 3 : index
    %c0_22 = arith.constant 0 : index
    %c0_23 = arith.constant 0 : index
    %21 = vector.load %arg2[%c3, %c0_22, %c0_23] : memref<9x32x162xf32, #tpu.memory_space<vmem>>, vector<1x32x162xf32>
    %22 = vector.shape_cast %21 : vector<1x32x162xf32> to vector<32x162xf32>
    %cst_24 = arith.constant dense<0.000000e+00> : vector<32x3xf32>
    %23 = tpu.matmul %22, %0, %cst_24 {dimension_numbers = #tpu.dot_dimension_numbers<[1], [0], [0], [1], [0, 0, 1, 1], [], []>} : vector<32x162xf32>, vector<162x3xf32>, vector<32x3xf32> -> vector<32x3xf32>
    %c3_25 = arith.constant 3 : index
    %c0_26 = arith.constant 0 : index
    %c0_27 = arith.constant 0 : index
    %24 = vector.load %arg3[%c3_25, %c0_26, %c0_27] : memref<9x3x32xf32, #tpu.memory_space<vmem>>, vector<1x3x32xf32>
    %25 = vector.shape_cast %24 : vector<1x3x32xf32> to vector<3x32xf32>
    %cst_28 = arith.constant dense<0.000000e+00> : vector<32x32xf32>
    %26 = tpu.matmul %23, %25, %cst_28 {dimension_numbers = #tpu.dot_dimension_numbers<[1], [0], [0], [1], [0, 0, 1, 1], [], []>} : vector<32x3xf32>, vector<3x32xf32>, vector<32x32xf32> -> vector<32x32xf32>
    %27 = arith.addf %20, %26 : vector<32x32xf32>
    %c4 = arith.constant 4 : index
    %c0_29 = arith.constant 0 : index
    %c0_30 = arith.constant 0 : index
    %28 = vector.load %arg2[%c4, %c0_29, %c0_30] : memref<9x32x162xf32, #tpu.memory_space<vmem>>, vector<1x32x162xf32>
    %29 = vector.shape_cast %28 : vector<1x32x162xf32> to vector<32x162xf32>
    %cst_31 = arith.constant dense<0.000000e+00> : vector<32x3xf32>
    %30 = tpu.matmul %29, %0, %cst_31 {dimension_numbers = #tpu.dot_dimension_numbers<[1], [0], [0], [1], [0, 0, 1, 1], [], []>} : vector<32x162xf32>, vector<162x3xf32>, vector<32x3xf32> -> vector<32x3xf32>
    %c4_32 = arith.constant 4 : index
    %c0_33 = arith.constant 0 : index
    %c0_34 = arith.constant 0 : index
    %31 = vector.load %arg3[%c4_32, %c0_33, %c0_34] : memref<9x3x32xf32, #tpu.memory_space<vmem>>, vector<1x3x32xf32>
    %32 = vector.shape_cast %31 : vector<1x3x32xf32> to vector<3x32xf32>
    %cst_35 = arith.constant dense<0.000000e+00> : vector<32x32xf32>
    %33 = tpu.matmul %30, %32, %cst_35 {dimension_numbers = #tpu.dot_dimension_numbers<[1], [0], [0], [1], [0, 0, 1, 1], [], []>} : vector<32x3xf32>, vector<3x32xf32>, vector<32x32xf32> -> vector<32x32xf32>
    %34 = arith.addf %27, %33 : vector<32x32xf32>
    %c5 = arith.constant 5 : index
    %c0_36 = arith.constant 0 : index
    %c0_37 = arith.constant 0 : index
    %35 = vector.load %arg2[%c5, %c0_36, %c0_37] : memref<9x32x162xf32, #tpu.memory_space<vmem>>, vector<1x32x162xf32>
    %36 = vector.shape_cast %35 : vector<1x32x162xf32> to vector<32x162xf32>
    %cst_38 = arith.constant dense<0.000000e+00> : vector<32x3xf32>
    %37 = tpu.matmul %36, %0, %cst_38 {dimension_numbers = #tpu.dot_dimension_numbers<[1], [0], [0], [1], [0, 0, 1, 1], [], []>} : vector<32x162xf32>, vector<162x3xf32>, vector<32x3xf32> -> vector<32x3xf32>
    %c5_39 = arith.constant 5 : index
    %c0_40 = arith.constant 0 : index
    %c0_41 = arith.constant 0 : index
    %38 = vector.load %arg3[%c5_39, %c0_40, %c0_41] : memref<9x3x32xf32, #tpu.memory_space<vmem>>, vector<1x3x32xf32>
    %39 = vector.shape_cast %38 : vector<1x3x32xf32> to vector<3x32xf32>
    %cst_42 = arith.constant dense<0.000000e+00> : vector<32x32xf32>
    %40 = tpu.matmul %37, %39, %cst_42 {dimension_numbers = #tpu.dot_dimension_numbers<[1], [0], [0], [1], [0, 0, 1, 1], [], []>} : vector<32x3xf32>, vector<3x32xf32>, vector<32x32xf32> -> vector<32x32xf32>
    %41 = arith.addf %34, %40 : vector<32x32xf32>
    %c6 = arith.constant 6 : index
    %c0_43 = arith.constant 0 : index
    %c0_44 = arith.constant 0 : index
    %42 = vector.load %arg2[%c6, %c0_43, %c0_44] : memref<9x32x162xf32, #tpu.memory_space<vmem>>, vector<1x32x162xf32>
    %43 = vector.shape_cast %42 : vector<1x32x162xf32> to vector<32x162xf32>
    %cst_45 = arith.constant dense<0.000000e+00> : vector<32x3xf32>
    %44 = tpu.matmul %43, %0, %cst_45 {dimension_numbers = #tpu.dot_dimension_numbers<[1], [0], [0], [1], [0, 0, 1, 1], [], []>} : vector<32x162xf32>, vector<162x3xf32>, vector<32x3xf32> -> vector<32x3xf32>
    %c6_46 = arith.constant 6 : index
    %c0_47 = arith.constant 0 : index
    %c0_48 = arith.constant 0 : index
    %45 = vector.load %arg3[%c6_46, %c0_47, %c0_48] : memref<9x3x32xf32, #tpu.memory_space<vmem>>, vector<1x3x32xf32>
    %46 = vector.shape_cast %45 : vector<1x3x32xf32> to vector<3x32xf32>
    %cst_49 = arith.constant dense<0.000000e+00> : vector<32x32xf32>
    %47 = tpu.matmul %44, %46, %cst_49 {dimension_numbers = #tpu.dot_dimension_numbers<[1], [0], [0], [1], [0, 0, 1, 1], [], []>} : vector<32x3xf32>, vector<3x32xf32>, vector<32x32xf32> -> vector<32x32xf32>
    %48 = arith.addf %41, %47 : vector<32x32xf32>
    %c7 = arith.constant 7 : index
    %c0_50 = arith.constant 0 : index
    %c0_51 = arith.constant 0 : index
    %49 = vector.load %arg2[%c7, %c0_50, %c0_51] : memref<9x32x162xf32, #tpu.memory_space<vmem>>, vector<1x32x162xf32>
    %50 = vector.shape_cast %49 : vector<1x32x162xf32> to vector<32x162xf32>
    %cst_52 = arith.constant dense<0.000000e+00> : vector<32x3xf32>
    %51 = tpu.matmul %50, %0, %cst_52 {dimension_numbers = #tpu.dot_dimension_numbers<[1], [0], [0], [1], [0, 0, 1, 1], [], []>} : vector<32x162xf32>, vector<162x3xf32>, vector<32x3xf32> -> vector<32x3xf32>
    %c7_53 = arith.constant 7 : index
    %c0_54 = arith.constant 0 : index
    %c0_55 = arith.constant 0 : index
    %52 = vector.load %arg3[%c7_53, %c0_54, %c0_55] : memref<9x3x32xf32, #tpu.memory_space<vmem>>, vector<1x3x32xf32>
    %53 = vector.shape_cast %52 : vector<1x3x32xf32> to vector<3x32xf32>
    %cst_56 = arith.constant dense<0.000000e+00> : vector<32x32xf32>
    %54 = tpu.matmul %51, %53, %cst_56 {dimension_numbers = #tpu.dot_dimension_numbers<[1], [0], [0], [1], [0, 0, 1, 1], [], []>} : vector<32x3xf32>, vector<3x32xf32>, vector<32x32xf32> -> vector<32x32xf32>
    %55 = arith.addf %48, %54 : vector<32x32xf32>
    %c8 = arith.constant 8 : index
    %c0_57 = arith.constant 0 : index
    %c0_58 = arith.constant 0 : index
    %56 = vector.load %arg2[%c8, %c0_57, %c0_58] : memref<9x32x162xf32, #tpu.memory_space<vmem>>, vector<1x32x162xf32>
    %57 = vector.shape_cast %56 : vector<1x32x162xf32> to vector<32x162xf32>
    %cst_59 = arith.constant dense<0.000000e+00> : vector<32x3xf32>
    %58 = tpu.matmul %57, %0, %cst_59 {dimension_numbers = #tpu.dot_dimension_numbers<[1], [0], [0], [1], [0, 0, 1, 1], [], []>} : vector<32x162xf32>, vector<162x3xf32>, vector<32x3xf32> -> vector<32x3xf32>
    %c8_60 = arith.constant 8 : index
    %c0_61 = arith.constant 0 : index
    %c0_62 = arith.constant 0 : index
    %59 = vector.load %arg3[%c8_60, %c0_61, %c0_62] : memref<9x3x32xf32, #tpu.memory_space<vmem>>, vector<1x3x32xf32>
    %60 = vector.shape_cast %59 : vector<1x3x32xf32> to vector<3x32xf32>
    %cst_63 = arith.constant dense<0.000000e+00> : vector<32x32xf32>
    %61 = tpu.matmul %58, %60, %cst_63 {dimension_numbers = #tpu.dot_dimension_numbers<[1], [0], [0], [1], [0, 0, 1, 1], [], []>} : vector<32x3xf32>, vector<3x32xf32>, vector<32x32xf32> -> vector<32x32xf32>
    %62 = arith.addf %55, %61 : vector<32x32xf32>
    %c0_64 = arith.constant 0 : index
    %c0_65 = arith.constant 0 : index
    %63 = vector.load %arg4[%c0_64, %c0_65] : memref<1x32xf32, #tpu.memory_space<vmem>>, vector<1x32xf32>
    %64 = vector.broadcast %63 : vector<1x32xf32> to vector<32x32xf32>
    %65 = arith.addf %62, %64 : vector<32x32xf32>
    %cst_66 = arith.constant 0.000000e+00 : f32
    %66 = vector.broadcast %cst_66 : f32 to vector<32x32xf32>
    %67 = arith.maximumf %65, %66 : vector<32x32xf32>
    %c0_67 = arith.constant 0 : index
    %c0_68 = arith.constant 0 : index
    %c0_69 = arith.constant 0 : index
    %68 = vector.load %arg5[%c0_67, %c0_68, %c0_69] : memref<4x18x32xf32, #tpu.memory_space<vmem>>, vector<1x18x32xf32>
    %69 = vector.shape_cast %68 : vector<1x18x32xf32> to vector<18x32xf32>
    %cst_70 = arith.constant dense<0.000000e+00> : vector<18x32xf32>
    %70 = tpu.matmul %69, %67, %cst_70 {dimension_numbers = #tpu.dot_dimension_numbers<[1], [0], [0], [1], [0, 0, 1, 1], [], []>} : vector<18x32xf32>, vector<32x32xf32>, vector<18x32xf32> -> vector<18x32xf32>
    %c0_71 = arith.constant 0 : index
    %c0_72 = arith.constant 0 : index
    %c0_73 = arith.constant 0 : index
    %71 = vector.load %arg6[%c0_71, %c0_72, %c0_73] : memref<4x32x64xf32, #tpu.memory_space<vmem>>, vector<1x32x64xf32>
    %72 = vector.shape_cast %71 : vector<1x32x64xf32> to vector<32x64xf32>
    %cst_74 = arith.constant dense<0.000000e+00> : vector<18x64xf32>
    %73 = tpu.matmul %70, %72, %cst_74 {dimension_numbers = #tpu.dot_dimension_numbers<[1], [0], [0], [1], [0, 0, 1, 1], [], []>} : vector<18x32xf32>, vector<32x64xf32>, vector<18x64xf32> -> vector<18x64xf32>
    %c1_75 = arith.constant 1 : index
    %c0_76 = arith.constant 0 : index
    %c0_77 = arith.constant 0 : index
    %74 = vector.load %arg5[%c1_75, %c0_76, %c0_77] : memref<4x18x32xf32, #tpu.memory_space<vmem>>, vector<1x18x32xf32>
    %75 = vector.shape_cast %74 : vector<1x18x32xf32> to vector<18x32xf32>
    %cst_78 = arith.constant dense<0.000000e+00> : vector<18x32xf32>
    %76 = tpu.matmul %75, %67, %cst_78 {dimension_numbers = #tpu.dot_dimension_numbers<[1], [0], [0], [1], [0, 0, 1, 1], [], []>} : vector<18x32xf32>, vector<32x32xf32>, vector<18x32xf32> -> vector<18x32xf32>
    %c1_79 = arith.constant 1 : index
    %c0_80 = arith.constant 0 : index
    %c0_81 = arith.constant 0 : index
    %77 = vector.load %arg6[%c1_79, %c0_80, %c0_81] : memref<4x32x64xf32, #tpu.memory_space<vmem>>, vector<1x32x64xf32>
    %78 = vector.shape_cast %77 : vector<1x32x64xf32> to vector<32x64xf32>
    %cst_82 = arith.constant dense<0.000000e+00> : vector<18x64xf32>
    %79 = tpu.matmul %76, %78, %cst_82 {dimension_numbers = #tpu.dot_dimension_numbers<[1], [0], [0], [1], [0, 0, 1, 1], [], []>} : vector<18x32xf32>, vector<32x64xf32>, vector<18x64xf32> -> vector<18x64xf32>
    %80 = arith.addf %73, %79 : vector<18x64xf32>
    %c2_83 = arith.constant 2 : index
    %c0_84 = arith.constant 0 : index
    %c0_85 = arith.constant 0 : index
    %81 = vector.load %arg5[%c2_83, %c0_84, %c0_85] : memref<4x18x32xf32, #tpu.memory_space<vmem>>, vector<1x18x32xf32>
    %82 = vector.shape_cast %81 : vector<1x18x32xf32> to vector<18x32xf32>
    %cst_86 = arith.constant dense<0.000000e+00> : vector<18x32xf32>
    %83 = tpu.matmul %82, %67, %cst_86 {dimension_numbers = #tpu.dot_dimension_numbers<[1], [0], [0], [1], [0, 0, 1, 1], [], []>} : vector<18x32xf32>, vector<32x32xf32>, vector<18x32xf32> -> vector<18x32xf32>
    %c2_87 = arith.constant 2 : index
    %c0_88 = arith.constant 0 : index
    %c0_89 = arith.constant 0 : index
    %84 = vector.load %arg6[%c2_87, %c0_88, %c0_89] : memref<4x32x64xf32, #tpu.memory_space<vmem>>, vector<1x32x64xf32>
    %85 = vector.shape_cast %84 : vector<1x32x64xf32> to vector<32x64xf32>
    %cst_90 = arith.constant dense<0.000000e+00> : vector<18x64xf32>
    %86 = tpu.matmul %83, %85, %cst_90 {dimension_numbers = #tpu.dot_dimension_numbers<[1], [0], [0], [1], [0, 0, 1, 1], [], []>} : vector<18x32xf32>, vector<32x64xf32>, vector<18x64xf32> -> vector<18x64xf32>
    %87 = arith.addf %80, %86 : vector<18x64xf32>
    %c3_91 = arith.constant 3 : index
    %c0_92 = arith.constant 0 : index
    %c0_93 = arith.constant 0 : index
    %88 = vector.load %arg5[%c3_91, %c0_92, %c0_93] : memref<4x18x32xf32, #tpu.memory_space<vmem>>, vector<1x18x32xf32>
    %89 = vector.shape_cast %88 : vector<1x18x32xf32> to vector<18x32xf32>
    %cst_94 = arith.constant dense<0.000000e+00> : vector<18x32xf32>
    %90 = tpu.matmul %89, %67, %cst_94 {dimension_numbers = #tpu.dot_dimension_numbers<[1], [0], [0], [1], [0, 0, 1, 1], [], []>} : vector<18x32xf32>, vector<32x32xf32>, vector<18x32xf32> -> vector<18x32xf32>
    %c3_95 = arith.constant 3 : index
    %c0_96 = arith.constant 0 : index
    %c0_97 = arith.constant 0 : index
    %91 = vector.load %arg6[%c3_95, %c0_96, %c0_97] : memref<4x32x64xf32, #tpu.memory_space<vmem>>, vector<1x32x64xf32>
    %92 = vector.shape_cast %91 : vector<1x32x64xf32> to vector<32x64xf32>
    %cst_98 = arith.constant dense<0.000000e+00> : vector<18x64xf32>
    %93 = tpu.matmul %90, %92, %cst_98 {dimension_numbers = #tpu.dot_dimension_numbers<[1], [0], [0], [1], [0, 0, 1, 1], [], []>} : vector<18x32xf32>, vector<32x64xf32>, vector<18x64xf32> -> vector<18x64xf32>
    %94 = arith.addf %87, %93 : vector<18x64xf32>
    %c0_99 = arith.constant 0 : index
    %c0_100 = arith.constant 0 : index
    %95 = vector.load %arg7[%c0_99, %c0_100] : memref<1x64xf32, #tpu.memory_space<vmem>>, vector<1x64xf32>
    %96 = vector.broadcast %95 : vector<1x64xf32> to vector<18x64xf32>
    %97 = arith.addf %94, %96 : vector<18x64xf32>
    %cst_101 = arith.constant 0.000000e+00 : f32
    %98 = vector.broadcast %cst_101 : f32 to vector<18x64xf32>
    %99 = arith.maximumf %97, %98 : vector<18x64xf32>
    %c0_102 = arith.constant 0 : index
    %c0_103 = arith.constant 0 : index
    %c0_104 = arith.constant 0 : index
    %100 = vector.load %arg8[%c0_102, %c0_103, %c0_104] : memref<9x2x18xf32, #tpu.memory_space<vmem>>, vector<1x2x18xf32>
    %101 = vector.shape_cast %100 : vector<1x2x18xf32> to vector<2x18xf32>
    %cst_105 = arith.constant dense<0.000000e+00> : vector<2x64xf32>
    %102 = tpu.matmul %101, %99, %cst_105 {dimension_numbers = #tpu.dot_dimension_numbers<[1], [0], [0], [1], [0, 0, 1, 1], [], []>} : vector<2x18xf32>, vector<18x64xf32>, vector<2x64xf32> -> vector<2x64xf32>
    %c0_106 = arith.constant 0 : index
    %c0_107 = arith.constant 0 : index
    %c0_108 = arith.constant 0 : index
    %103 = vector.load %arg9[%c0_106, %c0_107, %c0_108] : memref<9x64x32xf32, #tpu.memory_space<vmem>>, vector<1x64x32xf32>
    %104 = vector.shape_cast %103 : vector<1x64x32xf32> to vector<64x32xf32>
    %cst_109 = arith.constant dense<0.000000e+00> : vector<2x32xf32>
    %105 = tpu.matmul %102, %104, %cst_109 {dimension_numbers = #tpu.dot_dimension_numbers<[1], [0], [0], [1], [0, 0, 1, 1], [], []>} : vector<2x64xf32>, vector<64x32xf32>, vector<2x32xf32> -> vector<2x32xf32>
    %c1_110 = arith.constant 1 : index
    %c0_111 = arith.constant 0 : index
    %c0_112 = arith.constant 0 : index
    %106 = vector.load %arg8[%c1_110, %c0_111, %c0_112] : memref<9x2x18xf32, #tpu.memory_space<vmem>>, vector<1x2x18xf32>
    %107 = vector.shape_cast %106 : vector<1x2x18xf32> to vector<2x18xf32>
    %cst_113 = arith.constant dense<0.000000e+00> : vector<2x64xf32>
    %108 = tpu.matmul %107, %99, %cst_113 {dimension_numbers = #tpu.dot_dimension_numbers<[1], [0], [0], [1], [0, 0, 1, 1], [], []>} : vector<2x18xf32>, vector<18x64xf32>, vector<2x64xf32> -> vector<2x64xf32>
    %c1_114 = arith.constant 1 : index
    %c0_115 = arith.constant 0 : index
    %c0_116 = arith.constant 0 : index
    %109 = vector.load %arg9[%c1_114, %c0_115, %c0_116] : memref<9x64x32xf32, #tpu.memory_space<vmem>>, vector<1x64x32xf32>
    %110 = vector.shape_cast %109 : vector<1x64x32xf32> to vector<64x32xf32>
    %cst_117 = arith.constant dense<0.000000e+00> : vector<2x32xf32>
    %111 = tpu.matmul %108, %110, %cst_117 {dimension_numbers = #tpu.dot_dimension_numbers<[1], [0], [0], [1], [0, 0, 1, 1], [], []>} : vector<2x64xf32>, vector<64x32xf32>, vector<2x32xf32> -> vector<2x32xf32>
    %112 = arith.addf %105, %111 : vector<2x32xf32>
    %c2_118 = arith.constant 2 : index
    %c0_119 = arith.constant 0 : index
    %c0_120 = arith.constant 0 : index
    %113 = vector.load %arg8[%c2_118, %c0_119, %c0_120] : memref<9x2x18xf32, #tpu.memory_space<vmem>>, vector<1x2x18xf32>
    %114 = vector.shape_cast %113 : vector<1x2x18xf32> to vector<2x18xf32>
    %cst_121 = arith.constant dense<0.000000e+00> : vector<2x64xf32>
    %115 = tpu.matmul %114, %99, %cst_121 {dimension_numbers = #tpu.dot_dimension_numbers<[1], [0], [0], [1], [0, 0, 1, 1], [], []>} : vector<2x18xf32>, vector<18x64xf32>, vector<2x64xf32> -> vector<2x64xf32>
    %c2_122 = arith.constant 2 : index
    %c0_123 = arith.constant 0 : index
    %c0_124 = arith.constant 0 : index
    %116 = vector.load %arg9[%c2_122, %c0_123, %c0_124] : memref<9x64x32xf32, #tpu.memory_space<vmem>>, vector<1x64x32xf32>
    %117 = vector.shape_cast %116 : vector<1x64x32xf32> to vector<64x32xf32>
    %cst_125 = arith.constant dense<0.000000e+00> : vector<2x32xf32>
    %118 = tpu.matmul %115, %117, %cst_125 {dimension_numbers = #tpu.dot_dimension_numbers<[1], [0], [0], [1], [0, 0, 1, 1], [], []>} : vector<2x64xf32>, vector<64x32xf32>, vector<2x32xf32> -> vector<2x32xf32>
    %119 = arith.addf %112, %118 : vector<2x32xf32>
    %c3_126 = arith.constant 3 : index
    %c0_127 = arith.constant 0 : index
    %c0_128 = arith.constant 0 : index
    %120 = vector.load %arg8[%c3_126, %c0_127, %c0_128] : memref<9x2x18xf32, #tpu.memory_space<vmem>>, vector<1x2x18xf32>
    %121 = vector.shape_cast %120 : vector<1x2x18xf32> to vector<2x18xf32>
    %cst_129 = arith.constant dense<0.000000e+00> : vector<2x64xf32>
    %122 = tpu.matmul %121, %99, %cst_129 {dimension_numbers = #tpu.dot_dimension_numbers<[1], [0], [0], [1], [0, 0, 1, 1], [], []>} : vector<2x18xf32>, vector<18x64xf32>, vector<2x64xf32> -> vector<2x64xf32>
    %c3_130 = arith.constant 3 : index
    %c0_131 = arith.constant 0 : index
    %c0_132 = arith.constant 0 : index
    %123 = vector.load %arg9[%c3_130, %c0_131, %c0_132] : memref<9x64x32xf32, #tpu.memory_space<vmem>>, vector<1x64x32xf32>
    %124 = vector.shape_cast %123 : vector<1x64x32xf32> to vector<64x32xf32>
    %cst_133 = arith.constant dense<0.000000e+00> : vector<2x32xf32>
    %125 = tpu.matmul %122, %124, %cst_133 {dimension_numbers = #tpu.dot_dimension_numbers<[1], [0], [0], [1], [0, 0, 1, 1], [], []>} : vector<2x64xf32>, vector<64x32xf32>, vector<2x32xf32> -> vector<2x32xf32>
    %126 = arith.addf %119, %125 : vector<2x32xf32>
    %c4_134 = arith.constant 4 : index
    %c0_135 = arith.constant 0 : index
    %c0_136 = arith.constant 0 : index
    %127 = vector.load %arg8[%c4_134, %c0_135, %c0_136] : memref<9x2x18xf32, #tpu.memory_space<vmem>>, vector<1x2x18xf32>
    %128 = vector.shape_cast %127 : vector<1x2x18xf32> to vector<2x18xf32>
    %cst_137 = arith.constant dense<0.000000e+00> : vector<2x64xf32>
    %129 = tpu.matmul %128, %99, %cst_137 {dimension_numbers = #tpu.dot_dimension_numbers<[1], [0], [0], [1], [0, 0, 1, 1], [], []>} : vector<2x18xf32>, vector<18x64xf32>, vector<2x64xf32> -> vector<2x64xf32>
    %c4_138 = arith.constant 4 : index
    %c0_139 = arith.constant 0 : index
    %c0_140 = arith.constant 0 : index
    %130 = vector.load %arg9[%c4_138, %c0_139, %c0_140] : memref<9x64x32xf32, #tpu.memory_space<vmem>>, vector<1x64x32xf32>
    %131 = vector.shape_cast %130 : vector<1x64x32xf32> to vector<64x32xf32>
    %cst_141 = arith.constant dense<0.000000e+00> : vector<2x32xf32>
    %132 = tpu.matmul %129, %131, %cst_141 {dimension_numbers = #tpu.dot_dimension_numbers<[1], [0], [0], [1], [0, 0, 1, 1], [], []>} : vector<2x64xf32>, vector<64x32xf32>, vector<2x32xf32> -> vector<2x32xf32>
    %133 = arith.addf %126, %132 : vector<2x32xf32>
    %c5_142 = arith.constant 5 : index
    %c0_143 = arith.constant 0 : index
    %c0_144 = arith.constant 0 : index
    %134 = vector.load %arg8[%c5_142, %c0_143, %c0_144] : memref<9x2x18xf32, #tpu.memory_space<vmem>>, vector<1x2x18xf32>
    %135 = vector.shape_cast %134 : vector<1x2x18xf32> to vector<2x18xf32>
    %cst_145 = arith.constant dense<0.000000e+00> : vector<2x64xf32>
    %136 = tpu.matmul %135, %99, %cst_145 {dimension_numbers = #tpu.dot_dimension_numbers<[1], [0], [0], [1], [0, 0, 1, 1], [], []>} : vector<2x18xf32>, vector<18x64xf32>, vector<2x64xf32> -> vector<2x64xf32>
    %c5_146 = arith.constant 5 : index
    %c0_147 = arith.constant 0 : index
    %c0_148 = arith.constant 0 : index
    %137 = vector.load %arg9[%c5_146, %c0_147, %c0_148] : memref<9x64x32xf32, #tpu.memory_space<vmem>>, vector<1x64x32xf32>
    %138 = vector.shape_cast %137 : vector<1x64x32xf32> to vector<64x32xf32>
    %cst_149 = arith.constant dense<0.000000e+00> : vector<2x32xf32>
    %139 = tpu.matmul %136, %138, %cst_149 {dimension_numbers = #tpu.dot_dimension_numbers<[1], [0], [0], [1], [0, 0, 1, 1], [], []>} : vector<2x64xf32>, vector<64x32xf32>, vector<2x32xf32> -> vector<2x32xf32>
    %140 = arith.addf %133, %139 : vector<2x32xf32>
    %c6_150 = arith.constant 6 : index
    %c0_151 = arith.constant 0 : index
    %c0_152 = arith.constant 0 : index
    %141 = vector.load %arg8[%c6_150, %c0_151, %c0_152] : memref<9x2x18xf32, #tpu.memory_space<vmem>>, vector<1x2x18xf32>
    %142 = vector.shape_cast %141 : vector<1x2x18xf32> to vector<2x18xf32>
    %cst_153 = arith.constant dense<0.000000e+00> : vector<2x64xf32>
    %143 = tpu.matmul %142, %99, %cst_153 {dimension_numbers = #tpu.dot_dimension_numbers<[1], [0], [0], [1], [0, 0, 1, 1], [], []>} : vector<2x18xf32>, vector<18x64xf32>, vector<2x64xf32> -> vector<2x64xf32>
    %c6_154 = arith.constant 6 : index
    %c0_155 = arith.constant 0 : index
    %c0_156 = arith.constant 0 : index
    %144 = vector.load %arg9[%c6_154, %c0_155, %c0_156] : memref<9x64x32xf32, #tpu.memory_space<vmem>>, vector<1x64x32xf32>
    %145 = vector.shape_cast %144 : vector<1x64x32xf32> to vector<64x32xf32>
    %cst_157 = arith.constant dense<0.000000e+00> : vector<2x32xf32>
    %146 = tpu.matmul %143, %145, %cst_157 {dimension_numbers = #tpu.dot_dimension_numbers<[1], [0], [0], [1], [0, 0, 1, 1], [], []>} : vector<2x64xf32>, vector<64x32xf32>, vector<2x32xf32> -> vector<2x32xf32>
    %147 = arith.addf %140, %146 : vector<2x32xf32>
    %c7_158 = arith.constant 7 : index
    %c0_159 = arith.constant 0 : index
    %c0_160 = arith.constant 0 : index
    %148 = vector.load %arg8[%c7_158, %c0_159, %c0_160] : memref<9x2x18xf32, #tpu.memory_space<vmem>>, vector<1x2x18xf32>
    %149 = vector.shape_cast %148 : vector<1x2x18xf32> to vector<2x18xf32>
    %cst_161 = arith.constant dense<0.000000e+00> : vector<2x64xf32>
    %150 = tpu.matmul %149, %99, %cst_161 {dimension_numbers = #tpu.dot_dimension_numbers<[1], [0], [0], [1], [0, 0, 1, 1], [], []>} : vector<2x18xf32>, vector<18x64xf32>, vector<2x64xf32> -> vector<2x64xf32>
    %c7_162 = arith.constant 7 : index
    %c0_163 = arith.constant 0 : index
    %c0_164 = arith.constant 0 : index
    %151 = vector.load %arg9[%c7_162, %c0_163, %c0_164] : memref<9x64x32xf32, #tpu.memory_space<vmem>>, vector<1x64x32xf32>
    %152 = vector.shape_cast %151 : vector<1x64x32xf32> to vector<64x32xf32>
    %cst_165 = arith.constant dense<0.000000e+00> : vector<2x32xf32>
    %153 = tpu.matmul %150, %152, %cst_165 {dimension_numbers = #tpu.dot_dimension_numbers<[1], [0], [0], [1], [0, 0, 1, 1], [], []>} : vector<2x64xf32>, vector<64x32xf32>, vector<2x32xf32> -> vector<2x32xf32>
    %154 = arith.addf %147, %153 : vector<2x32xf32>
    %c8_166 = arith.constant 8 : index
    %c0_167 = arith.constant 0 : index
    %c0_168 = arith.constant 0 : index
    %155 = vector.load %arg8[%c8_166, %c0_167, %c0_168] : memref<9x2x18xf32, #tpu.memory_space<vmem>>, vector<1x2x18xf32>
    %156 = vector.shape_cast %155 : vector<1x2x18xf32> to vector<2x18xf32>
    %cst_169 = arith.constant dense<0.000000e+00> : vector<2x64xf32>
    %157 = tpu.matmul %156, %99, %cst_169 {dimension_numbers = #tpu.dot_dimension_numbers<[1], [0], [0], [1], [0, 0, 1, 1], [], []>} : vector<2x18xf32>, vector<18x64xf32>, vector<2x64xf32> -> vector<2x64xf32>
    %c8_170 = arith.constant 8 : index
    %c0_171 = arith.constant 0 : index
    %c0_172 = arith.constant 0 : index
    %158 = vector.load %arg9[%c8_170, %c0_171, %c0_172] : memref<9x64x32xf32, #tpu.memory_space<vmem>>, vector<1x64x32xf32>
    %159 = vector.shape_cast %158 : vector<1x64x32xf32> to vector<64x32xf32>
    %cst_173 = arith.constant dense<0.000000e+00> : vector<2x32xf32>
    %160 = tpu.matmul %157, %159, %cst_173 {dimension_numbers = #tpu.dot_dimension_numbers<[1], [0], [0], [1], [0, 0, 1, 1], [], []>} : vector<2x64xf32>, vector<64x32xf32>, vector<2x32xf32> -> vector<2x32xf32>
    %161 = arith.addf %154, %160 : vector<2x32xf32>
    %c0_174 = arith.constant 0 : index
    %c0_175 = arith.constant 0 : index
    %162 = vector.load %arg10[%c0_174, %c0_175] : memref<1x32xf32, #tpu.memory_space<vmem>>, vector<1x32xf32>
    %163 = vector.broadcast %162 : vector<1x32xf32> to vector<2x32xf32>
    %164 = arith.addf %161, %163 : vector<2x32xf32>
    %cst_176 = arith.constant 0.000000e+00 : f32
    %165 = vector.broadcast %cst_176 : f32 to vector<2x32xf32>
    %166 = arith.maximumf %164, %165 : vector<2x32xf32>
    %c0_177 = arith.constant 0 : index
    %c0_178 = arith.constant 0 : index
    %167 = vector.load %arg11[%c0_177, %c0_178] : memref<32x32xf32, #tpu.memory_space<vmem>>, vector<32x32xf32>
    %cst_179 = arith.constant dense<0.000000e+00> : vector<2x32xf32>
    %168 = tpu.matmul %166, %167, %cst_179 {dimension_numbers = #tpu.dot_dimension_numbers<[1], [0], [0], [1], [0, 0, 1, 1], [], []>} : vector<2x32xf32>, vector<32x32xf32>, vector<2x32xf32> -> vector<2x32xf32>
    %c0_180 = arith.constant 0 : index
    %c0_181 = arith.constant 0 : index
    %169 = vector.load %arg1[%c0_180, %c0_181] : memref<2x4xf32, #tpu.memory_space<vmem>>, vector<2x4xf32>
    %c0_182 = arith.constant 0 : index
    %c0_183 = arith.constant 0 : index
    %170 = vector.load %arg12[%c0_182, %c0_183] : memref<4x32xf32, #tpu.memory_space<vmem>>, vector<4x32xf32>
    %cst_184 = arith.constant dense<0.000000e+00> : vector<2x32xf32>
    %171 = tpu.matmul %169, %170, %cst_184 {dimension_numbers = #tpu.dot_dimension_numbers<[1], [0], [0], [1], [0, 0, 1, 1], [], []>} : vector<2x4xf32>, vector<4x32xf32>, vector<2x32xf32> -> vector<2x32xf32>
    %172 = arith.addf %168, %171 : vector<2x32xf32>
    %c0_185 = arith.constant 0 : index
    %c0_186 = arith.constant 0 : index
    %173 = vector.load %arg13[%c0_185, %c0_186] : memref<1x32xf32, #tpu.memory_space<vmem>>, vector<1x32xf32>
    %174 = vector.broadcast %173 : vector<1x32xf32> to vector<2x32xf32>
    %175 = arith.addf %172, %174 : vector<2x32xf32>
    %cst_187 = arith.constant 0.000000e+00 : f32
    %176 = vector.broadcast %cst_187 : f32 to vector<2x32xf32>
    %177 = arith.maximumf %175, %176 : vector<2x32xf32>
    %c0_188 = arith.constant 0 : index
    %c0_189 = arith.constant 0 : index
    %178 = vector.load %arg14[%c0_188, %c0_189] : memref<32x12xf32, #tpu.memory_space<vmem>>, vector<32x12xf32>
    %cst_190 = arith.constant dense<0.000000e+00> : vector<2x12xf32>
    %179 = tpu.matmul %177, %178, %cst_190 {dimension_numbers = #tpu.dot_dimension_numbers<[1], [0], [0], [1], [0, 0, 1, 1], [], []>} : vector<2x32xf32>, vector<32x12xf32>, vector<2x12xf32> -> vector<2x12xf32>
    %c0_191 = arith.constant 0 : index
    %c0_192 = arith.constant 0 : index
    %180 = vector.load %arg15[%c0_191, %c0_192] : memref<1x12xf32, #tpu.memory_space<vmem>>, vector<1x12xf32>
    %181 = vector.broadcast %180 : vector<1x12xf32> to vector<2x12xf32>
    %182 = arith.addf %179, %181 : vector<2x12xf32>
    %cst_193 = arith.constant 0.000000e+00 : f32
    %183 = vector.broadcast %cst_193 : f32 to vector<2x12xf32>
    %184 = arith.maximumf %182, %183 : vector<2x12xf32>
    %c0_194 = arith.constant 0 : index
    %c0_195 = arith.constant 0 : index
    %185 = vector.load %arg16[%c0_194, %c0_195] : memref<12x5xf32, #tpu.memory_space<vmem>>, vector<12x5xf32>
    %cst_196 = arith.constant dense<0.000000e+00> : vector<2x5xf32>
    %186 = tpu.matmul %184, %185, %cst_196 {dimension_numbers = #tpu.dot_dimension_numbers<[1], [0], [0], [1], [0, 0, 1, 1], [], []>} : vector<2x12xf32>, vector<12x5xf32>, vector<2x5xf32> -> vector<2x5xf32>
    %c0_197 = arith.constant 0 : index
    %c0_198 = arith.constant 0 : index
    %187 = vector.load %arg17[%c0_197, %c0_198] : memref<1x5xf32, #tpu.memory_space<vmem>>, vector<1x5xf32>
    %188 = vector.broadcast %187 : vector<1x5xf32> to vector<2x5xf32>
    %189 = arith.addf %186, %188 : vector<2x5xf32>
    %c0_199 = arith.constant 0 : index
    %c0_200 = arith.constant 0 : index
    %190 = vector.load %arg18[%c0_199, %c0_200] : memref<2x5xf32, #tpu.memory_space<vmem>>, vector<2x5xf32>
    tpu.vector_store %arg18[%c0_199, %c0_200], %189 {strides = array<i32>} : memref<2x5xf32, #tpu.memory_space<vmem>>, vector<2x5xf32>,
    return
  }
}

</mosaic_0001>

<bundles_post_ra>
// kernel: cnn_version2_forward.1
= control target key start
LH: loop header
LB: loop body
LE: loop exit
PB: predicated region body
PF: predicated region fallthrough
CT: control target
= control target key end

     0   :  { %s7436_s0 = inlined_call_operand.vmem [shape: f32[162,3], index: 0, kind: input, shape index: {}]   ;;  %s7437_s1 = inlined_call_operand.vmem [shape: f32[2,4], index: 1, kind: input, shape index: {}]   ;;  %s7438_s2 = inlined_call_operand.vmem [shape: f32[9,32,162], index: 2, kind: input, shape index: {}]   ;;  %s7439_s3 = inlined_call_operand.vmem [shape: f32[9,3,32], index: 3, kind: input, shape index: {}]   ;;  %s7440_s4 = inlined_call_operand.vmem [shape: f32[1,32], index: 4, kind: input, shape index: {}]   ;;  %s7441_s5 = inlined_call_operand.vmem [shape: f32[4,18,32], index: 5, kind: input, shape index: {}]   ;;  %s7442_s6 = inlined_call_operand.vmem [shape: f32[4,32,64], index: 6, kind: input, shape index: {}]   ;;  %s7443_s7 = inlined_call_operand.vmem [shape: f32[1,64], index: 7, kind: input, shape index: {}]   ;;  %s7444_s8 = inlined_call_operand.vmem [shape: f32[9,2,18], index: 8, kind: input, shape index: {}]   ;;  %s7445_s9 = inlined_call_operand.vmem [shape: f32[9,64,32], index: 9, kind: input, shape index: {}]   ;;  %s7446_s10 = inlined_call_operand.vmem [shape: f32[1,32], index: 10, kind: input, shape index: {}]   ;;  %s7447_s11 = inlined_call_operand.vmem [shape: f32[32,32], index: 11, kind: input, shape index: {}]   ;;  %s7448_s12 = inlined_call_operand.vmem [shape: f32[4,32], index: 12, kind: input, shape index: {}]   ;;  %s7449_s13 = inlined_call_operand.vmem [shape: f32[1,32], index: 13, kind: input, shape index: {}]   ;;  %s7450_s14 = inlined_call_operand.vmem [shape: f32[32,12], index: 14, kind: input, shape index: {}]   ;;  %s7451_s15 = inlined_call_operand.vmem [shape: f32[1,12], index: 15, kind: input, shape index: {}]   ;;  %s7452_s16 = inlined_call_operand.vmem [shape: f32[12,5], index: 16, kind: input, shape index: {}]   ;;  %s7453_s17 = inlined_call_operand.vmem [shape: f32[1,5], index: 17, kind: input, shape index: {}]   ;;  %s7454_s18 = inlined_call_operand.hbm [shape: f32[2,5], index: 18, kind: output, shape index: {}]  }
   0x1   :  { %7457 = sst [smem:[#allocation5_spill]] %s7436_s0 }
   0x2   :  { %7458 = sst [smem:[#allocation6_spill]] %s7437_s1 }
   0x3   :  { %7459 = sst [smem:[#allocation7_spill]] %s7438_s2 }
   0x4   :  { %s7460_s29 = sld [smem:[#allocation5_spill]]  ;;  %v5643_v1 = vmov 0.0  }
   0x5   :  { %106 = vmatprep.subr.mxu0 %v5643_v1  ;;  %213 = vmatprep.subr.mxu1 %v5643_v1 }
   0xa   :  { %v5744_v0 = vld [vmem:[%s7460_s29 + $0x78] sm:$0xff]  ;;  %v5751_v2 = vld [vmem:[%s7460_s29 + $0x70] sm:$0xff]  ;;  %v5760_v3 = vld [vmem:[%s7460_s29 + $0x68] sm:$0xff] }
   0xb   :  { %107 = vmatpush1.msra.mxu0 %v5744_v0  ;;  %214 = vmatpush1.msra.mxu1 %v5744_v0  ;;  %v5769_v4 = vld [vmem:[%s7460_s29 + $0x60] sm:$0xff]  ;;  %v5778_v5 = vld [vmem:[%s7460_s29 + $0x58] sm:$0xff]  ;;  %v5787_v6 = vld [vmem:[%s7460_s29 + $0x50] sm:$0xff] }
   0xc   :  { %108 = vmatprep.subr.mxu0 %v5643_v1  ;;  %215 = vmatprep.subr.mxu1 %v5643_v1  ;;  %v5796_v7 = vld [vmem:[%s7460_s29 + $0x48] sm:$0xff] }
   0xd   :  { %109 = vmatpush1.msra.mxu0 %v5751_v2  ;;  %216 = vmatpush1.msra.mxu1 %v5751_v2 }
   0xe   :  { %110 = vmatprep.subr.mxu0 %v5643_v1  ;;  %217 = vmatprep.subr.mxu1 %v5643_v1 }
   0xf   :  { %111 = vmatpush1.msra.mxu0 %v5760_v3  ;;  %218 = vmatpush1.msra.mxu1 %v5760_v3 }
  0x10   :  { %112 = vmatprep.subr.mxu0 %v5643_v1  ;;  %219 = vmatprep.subr.mxu1 %v5643_v1 }
  0x11   :  { %113 = vmatpush1.msra.mxu0 %v5769_v4  ;;  %220 = vmatpush1.msra.mxu1 %v5769_v4 }
  0x12   :  { %114 = vmatprep.subr.mxu0 %v5643_v1  ;;  %221 = vmatprep.subr.mxu1 %v5643_v1 }
  0x13   :  { %115 = vmatpush1.msra.mxu0 %v5778_v5  ;;  %222 = vmatpush1.msra.mxu1 %v5778_v5 }
  0x14   :  { %116 = vmatprep.subr.mxu0 %v5643_v1  ;;  %223 = vmatprep.subr.mxu1 %v5643_v1 }
  0x15   :  { %117 = vmatpush1.msra.mxu0 %v5787_v6  ;;  %224 = vmatpush1.msra.mxu1 %v5787_v6 }
  0x16   :  { %23 = vsyncpa [#allocation3], 0  ;;  %118 = vmatprep.subr.mxu0 %v5643_v1  ;;  %225 = vmatprep.subr.mxu1 %v5643_v1  ;;  %v5805_v8 = vld [vmem:[%s7460_s29 + $0x40] sm:$0xff]  ;;  %v5814_v9 = vld [vmem:[%s7460_s29 + $0x38] sm:$0xff]  ;;  %vm102_vm0 = vcmask 1041408   ;;  %s7461_s30 = sld [smem:[#allocation7_spill]] }
  0x17   :  { %119 = vmatpush1.msra.mxu0 %v5796_v7  ;;  %226 = vmatpush1.msra.mxu1 %v5796_v7  ;;  %v5823_v10 = vld [vmem:[%s7460_s29 + $0x30] sm:$0xff]  ;;  %v5832_v11 = vld [vmem:[%s7460_s29 + $0x28] sm:$0xff]  ;;  %v5841_v12 = vld [vmem:[%s7460_s29 + $0x20] sm:$0xff]  ;;  %vm89_vm1 = vcmask 277504   ;;  %vm313_vm2 = vcmask 1042432   ;;  %vm300_vm3 = vcmask 23552  }
  0x18   :  { %120 = vmatprep.subr.mxu0 %v5643_v1  ;;  %227 = vmatprep.subr.mxu1 %v5643_v1  ;;  %v5850_v13 = vld [vmem:[%s7460_s29 + $0x18] sm:$0xff]  ;;  %v5859_v14 = vld [vmem:[%s7460_s29 + $0x10] sm:$0xff]  ;;  %v5868_v15 = vld [vmem:[%s7460_s29 + $0x8] sm:$0xff]  ;;  %vm5644_vm4 = vmmov 0   ;;  %vm2004_vm5 = vcmask 261120   ;;  %vm2768_vm6 = vcmask 146432  }
  0x19   :  { %121 = vmatpush1.msra.mxu0 %v5805_v8  ;;  %228 = vmatpush1.msra.mxu1 %v5805_v8  ;;  %v5877_v16 = vld [vmem:[%s7460_s29] sm:$0xff]  ;;  %v5895_v18 = vld [vmem:[%s7460_s29 + $0x98] sm:$0xff]  ;;  %v5906_v19 = vld [vmem:[%s7460_s29 + $0x90] sm:$0xff]  ;;  %vm2937_vm7 = vcmask 523264   ;;  %vm4209_vm8 = vcmask 1043456   ;;  %s7462_s27 = sld [smem:[#allocation6_spill]] }
  0x1a   :  { %122 = vmatprep.subr.mxu0 %v5643_v1  ;;  %229 = vmatprep.subr.mxu1 %v5643_v1  ;;  %v5886_v17 = vld [vmem:[%s7460_s29 + $0xa0] sm:$0x3]  ;;  %v5915_v20 = vld [vmem:[%s7460_s29 + $0x88] sm:$0xff]  ;;  %v4570_v28 = vld [vmem:[%s7439_s3 + $0x4] sm:$0x7]  ;;  %vm4205_vm9 = vcmask 31744  }
  0x1b   :  { %123 = vmatpush1.msra.mxu0 %v5814_v9  ;;  %230 = vmatpush1.msra.mxu1 %v5814_v9  ;;  %v5924_v21 = vld [vmem:[%s7460_s29 + $0x80] sm:$0xff]  ;;  %vm4459_vm10 = vcmask 97280   ;;  %vm4536_vm11 = vcmask 33792  }
  0x1c   :  { %124 = vmatprep.subr.mxu0 %v5643_v1  ;;  %231 = vmatprep.subr.mxu1 %v5643_v1  ;;  %v82_v22 = vld [vmem:[%s7461_s30 + $0x8] sm:$0xff]  ;;  %v81_v24 = vld [vmem:[%s7461_s30] sm:$0xff]  ;;  %v84_v26 = vld [vmem:[%s7461_s30 + $0x18] sm:$0xff] }
  0x1d   :  { %125 = vmatpush1.msra.mxu0 %v5823_v10  ;;  %232 = vmatpush1.msra.mxu1 %v5823_v10  ;;  %v4558_v23 = vld [vmem:[%s7461_s30 + $0x48] sm:$0xff]  ;;  %v4557_v25 = vld [vmem:[%s7461_s30 + $0x40] sm:$0xff]  ;;  %v4560_v27 = vld [vmem:[%s7461_s30 + $0x58] sm:$0xff] }
  0x1e   :  { %126 = vmatprep.subr.mxu0 %v5643_v1  ;;  %233 = vmatprep.subr.mxu1 %v5643_v1  ;;  %v83_v29 = vld [vmem:[%s7461_s30 + $0x10] sm:$0xff]  ;;  %v86_v31 = vld [vmem:[%s7461_s30 + $0x28] sm:$0xff]  ;;  %v85_v33 = vld [vmem:[%s7461_s30 + $0x20] sm:$0xff] }
  0x1f   :  { %127 = vmatpush1.msra.mxu0 %v5832_v11  ;;  %234 = vmatpush1.msra.mxu1 %v5832_v11  ;;  %v4559_v30 = vld [vmem:[%s7461_s30 + $0x50] sm:$0xff]  ;;  %v4562_v32 = vld [vmem:[%s7461_s30 + $0x68] sm:$0xff]  ;;  %v4561_v34 = vld [vmem:[%s7461_s30 + $0x60] sm:$0xff] }
  0x20   :  { %128 = vmatprep.subr.mxu0 %v5643_v1  ;;  %235 = vmatprep.subr.mxu1 %v5643_v1  ;;  %v88_v35 = vld [vmem:[%s7461_s30 + $0x38] sm:$0xff]  ;;  %v87_v37 = vld [vmem:[%s7461_s30 + $0x30] sm:$0xff]  ;;  %v191_v39 = vld [vmem:[%s7439_s3] sm:$0x7] }
  0x21   :  { %129 = vmatpush1.msra.mxu0 %v5841_v12  ;;  %236 = vmatpush1.msra.mxu1 %v5841_v12  ;;  %v4564_v36 = vld [vmem:[%s7461_s30 + $0x78] sm:$0xff]  ;;  %v4563_v38 = vld [vmem:[%s7461_s30 + $0x70] sm:$0xff]  ;;  %v4582_v54 = vld [vmem:[%s7461_s30 + $0x88] sm:$0xff] }
  0x22   :  { %130 = vmatprep.subr.mxu0 %v5643_v1  ;;  %237 = vmatprep.subr.mxu1 %v5643_v1  ;;  %v4581_v57 = vld [vmem:[%s7461_s30 + $0x80] sm:$0xff]  ;;  %v4584_v58 = vld [vmem:[%s7461_s30 + $0x98] sm:$0xff]  ;;  %v4583_v59 = vld [vmem:[%s7461_s30 + $0x90] sm:$0xff] }
  0x23   :  { %131 = vmatpush1.msra.mxu0 %v5850_v13  ;;  %238 = vmatpush1.msra.mxu1 %v5850_v13  ;;  %v4586_v60 = vld [vmem:[%s7461_s30 + $0xa8] sm:$0xff]  ;;  %v4585_v61 = vld [vmem:[%s7461_s30 + $0xa0] sm:$0xff]  ;;  %v4588_v62 = vld [vmem:[%s7461_s30 + $0xb8] sm:$0xff] }
  0x24   :  { %132 = vmatprep.subr.mxu0 %v5643_v1  ;;  %239 = vmatprep.subr.mxu1 %v5643_v1  ;;  %v4587_v63 = vld [vmem:[%s7461_s30 + $0xb0] sm:$0xff] }
  0x25   :  { %133 = vmatpush1.msra.mxu0 %v5859_v14  ;;  %240 = vmatpush1.msra.mxu1 %v5859_v14 }
  0x26   :  { %134 = vmatprep.subr.mxu0 %v5643_v1  ;;  %241 = vmatprep.subr.mxu1 %v5643_v1 }
  0x27   :  { %135 = vmatpush1.msra.mxu0 %v5868_v15  ;;  %242 = vmatpush1.msra.mxu1 %v5868_v15 }
  0x28   :  { %136 = vmatprep.subr.mxu0 %v5643_v1  ;;  %243 = vmatprep.subr.mxu1 %v5643_v1 }
  0x29   :  { %137 = vmatpush1.msra.mxu0 %v5877_v16  ;;  %244 = vmatpush1.msra.mxu1 %v5877_v16 }
  0x2a   :  { %160 = vmatprep.subr.mxu0 %v5643_v1  ;;  %267 = vmatprep.subr.mxu1 %v5643_v1 }
  0x2b   :  { %4552 = vmatpush2.msk.msra.mxu0 %vm102_vm0, %v5886_v17  ;;  %4565 = vmatpush2.msk.msra.mxu1 %vm102_vm0, %v5886_v17 }
  0x2c   :  { %162 = vmatprep.subr.mxu0 %v5643_v1  ;;  %269 = vmatprep.subr.mxu1 %v5643_v1 }
  0x2d   :  { %163 = vmatpush2.msra.mxu0 %v5895_v18  ;;  %270 = vmatpush2.msra.mxu1 %v5895_v18 }
  0x2e   :  { %164 = vmatprep.subr.mxu0 %v5643_v1  ;;  %271 = vmatprep.subr.mxu1 %v5643_v1 }
  0x2f   :  { %165 = vmatpush2.msra.mxu0 %v5906_v19  ;;  %272 = vmatpush2.msra.mxu1 %v5906_v19 }
  0x30   :  { %166 = vmatprep.subr.mxu0 %v5643_v1  ;;  %273 = vmatprep.subr.mxu1 %v5643_v1 }
  0x31   :  { %167 = vmatpush2.msra.mxu0 %v5915_v20  ;;  %274 = vmatpush2.msra.mxu1 %v5915_v20 }
  0x32   :  { %168 = vmatprep.subr.mxu0 %v5643_v1  ;;  %275 = vmatprep.subr.mxu1 %v5643_v1 }
  0x33   :  { %169 = vmatpush2.msra.mxu0 %v5924_v21  ;;  %4553 = vmatprep.mubr.msk.f32.mxu0 %vm89_vm1, %v82_v22  ;;  %v4594_v22 = vld [vmem:[%s7439_s3 + $0x8] sm:$0x7] }
  0x34   :  { %276 = vmatpush2.msra.mxu1 %v5924_v21  ;;  %4566 = vmatprep.mubr.msk.f32.mxu1 %vm89_vm1, %v4558_v23 }
  0x35   :  { %171 = vmatmul.mubr.f32.vlgmr.msra.gmra.mxu0 %v81_v24  ;;  %278 = vmatmul.mubr.f32.vlgmr.msra.gmra.mxu1 %v4557_v25 }
  0x36   :  { %4554 = vmatprep.mubr.msk.f32.mxu0 %vm89_vm1, %v84_v26  ;;  %4567 = vmatprep.mubr.msk.f32.mxu1 %vm89_vm1, %v4560_v27 }
  0x37   :  { %5103 = vmatprep.subr.msk.mxu0 %vm313_vm2, %v4570_v28  ;;  %5111 = vmatprep.subr.msk.mxu1 %vm313_vm2, %v191_v39 }
  0x38   :  { %5104 = vmatpush3.msk.msra.mxu0 %vm313_vm2, %v4570_v28  ;;  %5112 = vmatpush3.msk.msra.mxu1 %vm313_vm2, %v191_v39  ;;  %v4601_v39 = vld [vmem:[%s7461_s30 + $0xc8] sm:$0xff] }
  0x39   :  { %176 = vmatmul.mubr.f32.gmra.mxu0 %v83_v29  ;;  %283 = vmatmul.mubr.f32.gmra.mxu1 %v4559_v30 }
  0x3a   :  { %4555 = vmatprep.mubr.msk.f32.mxu0 %vm89_vm1, %v86_v31  ;;  %4568 = vmatprep.mubr.msk.f32.mxu1 %vm89_vm1, %v4562_v32 }
  0x3b   :  { %523 = vmatprep.subr.mxu0 %v5643_v1  ;;  %5119 = vmatprep.subr.msk.mxu1 %vm313_vm2, %v4594_v22 }
  0x3d   :  { %181 = vmatmul.mubr.f32.gmra.mxu0 %v85_v33  ;;  %288 = vmatmul.mubr.f32.gmra.mxu1 %v4561_v34 }
  0x3e   :  { %4556 = vmatprep.mubr.msk.f32.mxu0 %vm89_vm1, %v88_v35  ;;  %4569 = vmatprep.mubr.msk.f32.mxu1 %vm89_vm1, %v4564_v36 }
  0x41   :  { %186 = vmatmul.mubr.f32.gmra.mxu0 %v87_v37  ;;  %293 = vmatmul.mubr.f32.gmra.mxu1 %v4563_v38 }
  0xf5   :  { %v172_v40 = vpop.f32.mrf.mxu0  ;;  %v279_v41 = vpop.f32.mrf.mxu1 }
  0xf6   :  { %5105 = vmatprep.mubr.msk.f32.mxu0 %vm300_vm3, %v279_v41  ;;  %5113 = vmatprep.mubr.msk.f32.mxu1 %vm300_vm3, %v172_v40 }
  0xf7   :  { %v174_v42 = vpop.f32.mrf.mxu0  ;;  %v281_v43 = vpop.f32.mrf.mxu1 }
  0xf8   :  { %v4600_v42 = vld [vmem:[%s7461_s30 + $0xc0] sm:$0xff]  ;;  %v4603_v43 = vld [vmem:[%s7461_s30 + $0xd8] sm:$0xff] }
  0xf9   :  { %v177_v44 = vpop.f32.mrf.mxu0  ;;  %v284_v45 = vpop.f32.mrf.mxu1 }
  0xfa   :  { %5106 = vmatmul.mubr.msk.f32.vlgmr.msra.gmra.mxu0 %vm300_vm3, %v284_v45  ;;  %5114 = vmatmul.mubr.msk.f32.vlgmr.msra.gmra.mxu1 %vm300_vm3, %v177_v44  ;;  %v4602_v44 = vld [vmem:[%s7461_s30 + $0xd0] sm:$0xff]  ;;  %v4605_v45 = vld [vmem:[%s7461_s30 + $0xe8] sm:$0xff] }
  0xfb   :  { %524 = vmatpush1.msra.mxu0 %v5744_v0  ;;  %v286_v46 = vpop.f32.mrf.mxu1  ;;  %v179_v47 = vpop.f32.mrf.mxu0  ;;  %5120 = vmatpush3.msk.msra.mxu1 %vm313_vm2, %v4594_v22 }
  0xfc   :  { %525 = vmatprep.subr.mxu0 %v5643_v1  ;;  %735 = vmatprep.subr.mxu1 %v5643_v1  ;;  %v4604_v46 = vld [vmem:[%s7461_s30 + $0xe0] sm:$0xff]  ;;  %v4607_v47 = vld [vmem:[%s7461_s30 + $0xf8] sm:$0xff] }
  0xfd   :  { %526 = vmatpush1.msra.mxu0 %v5751_v2  ;;  %v182_v48 = vpop.f32.mrf.mxu0  ;;  %v289_v49 = vpop.f32.mrf.mxu1 }
  0xfe   :  { %527 = vmatprep.subr.mxu0 %v5643_v1  ;;  %5108 = vmatprep.mubr.msk.f32.mxu0 %vm300_vm3, %v289_v49  ;;  %v4620_v49 = vld [vmem:[%s7461_s30 + $0x108] sm:$0xff] }
  0xff   :  { %528 = vmatpush1.msra.mxu0 %v5760_v3  ;;  %v184_v50 = vpop.f32.mrf.mxu0  ;;  %v291_v51 = vpop.f32.mrf.mxu1  ;;  %5116 = vmatprep.mubr.msk.f32.mxu1 %vm300_vm3, %v182_v48  ;;  %v4606_v48 = vld [vmem:[%s7461_s30 + $0xf0] sm:$0xff] }
 0x100   :  { %529 = vmatprep.subr.mxu0 %v5643_v1  ;;  %v4619_v50 = vld [vmem:[%s7461_s30 + $0x100] sm:$0xff]  ;;  %v4622_v51 = vld [vmem:[%s7461_s30 + $0x118] sm:$0xff] }
 0x101   :  { %530 = vmatpush1.msra.mxu0 %v5769_v4  ;;  %v187_v52 = vpop.f32.mrf.mxu0  ;;  %v294_v53 = vpop.f32.mrf.mxu1 }
 0x102   :  { %531 = vmatprep.subr.mxu0 %v5643_v1  ;;  %5109 = vmatmul.mubr.msk.f32.gmra.mxu0 %vm300_vm3, %v294_v53  ;;  %v4624_v53 = vld [vmem:[%s7461_s30 + $0x128] sm:$0xff] }
 0x103   :  { %532 = vmatpush1.msra.mxu0 %v5778_v5  ;;  %5117 = vmatmul.mubr.msk.f32.gmra.mxu1 %vm300_vm3, %v187_v52  ;;  %v296_v55 = vpop.f32.mrf.mxu1  ;;  %v189_v56 = vpop.f32.mrf.mxu0  ;;  %v4621_v52 = vld [vmem:[%s7461_s30 + $0x110] sm:$0xff] }
 0x104   :  { %533 = vmatprep.subr.mxu0 %v5643_v1  ;;  %4590 = vmatprep.mubr.msk.f32.mxu0 %vm89_vm1, %v4582_v54  ;;  %v4623_v54 = vld [vmem:[%s7461_s30 + $0x120] sm:$0xff]  ;;  %v4626_v55 = vld [vmem:[%s7461_s30 + $0x138] sm:$0xff]  ;;  %v4625_v56 = vld [vmem:[%s7461_s30 + $0x130] sm:$0xff] }
 0x105   :  { %534 = vmatpush1.msra.mxu0 %v5787_v6 }
 0x106   :  { %535 = vmatprep.subr.mxu0 %v5643_v1 }
 0x107   :  { %536 = vmatpush1.msra.mxu0 %v5796_v7 }
 0x108   :  { %537 = vmatprep.subr.mxu0 %v5643_v1 }
 0x109   :  { %538 = vmatpush1.msra.mxu0 %v5805_v8 }
 0x10a   :  { %539 = vmatprep.subr.mxu0 %v5643_v1 }
 0x10b   :  { %540 = vmatpush1.msra.mxu0 %v5814_v9 }
 0x10c   :  { %541 = vmatprep.subr.mxu0 %v5643_v1 }
 0x10d   :  { %542 = vmatpush1.msra.mxu0 %v5823_v10 }
 0x10e   :  { %543 = vmatprep.subr.mxu0 %v5643_v1 }
 0x10f   :  { %544 = vmatpush1.msra.mxu0 %v5832_v11 }
 0x110   :  { %545 = vmatprep.subr.mxu0 %v5643_v1 }
 0x111   :  { %546 = vmatpush1.msra.mxu0 %v5841_v12 }
 0x112   :  { %547 = vmatprep.subr.mxu0 %v5643_v1 }
 0x113   :  { %548 = vmatpush1.msra.mxu0 %v5850_v13 }
 0x114   :  { %549 = vmatprep.subr.mxu0 %v5643_v1 }
 0x115   :  { %550 = vmatpush1.msra.mxu0 %v5859_v14 }
 0x116   :  { %551 = vmatprep.subr.mxu0 %v5643_v1 }
 0x117   :  { %552 = vmatpush1.msra.mxu0 %v5868_v15 }
 0x118   :  { %553 = vmatprep.subr.mxu0 %v5643_v1 }
 0x119   :  { %554 = vmatpush1.msra.mxu0 %v5877_v16 }
 0x11a   :  { %577 = vmatprep.subr.mxu0 %v5643_v1 }
 0x11b   :  { %4589 = vmatpush2.msk.msra.mxu0 %vm102_vm0, %v5886_v17 }
 0x11c   :  { %579 = vmatprep.subr.mxu0 %v5643_v1 }
 0x11d   :  { %580 = vmatpush2.msra.mxu0 %v5895_v18 }
 0x11e   :  { %581 = vmatprep.subr.mxu0 %v5643_v1 }
 0x11f   :  { %582 = vmatpush2.msra.mxu0 %v5906_v19 }
 0x120   :  { %583 = vmatprep.subr.mxu0 %v5643_v1 }
 0x121   :  { %584 = vmatpush2.msra.mxu0 %v5915_v20 }
 0x122   :  { %585 = vmatprep.subr.mxu0 %v5643_v1 }
 0x123   :  { %586 = vmatpush2.msra.mxu0 %v5924_v21 }
 0x124   :  { %588 = vmatmul.mubr.f32.vlgmr.msra.gmra.mxu0 %v4581_v57  ;;  %v4613_v57 = vld [vmem:[%s7439_s3 + $0xc] sm:$0x7] }
 0x125   :  { %4591 = vmatprep.mubr.msk.f32.mxu0 %vm89_vm1, %v4584_v58  ;;  %5127 = vmatprep.subr.msk.mxu0 %vm313_vm2, %v4613_v57  ;;  %v4632_v58 = vld [vmem:[%s7439_s3 + $0x10] sm:$0x7] }
 0x126   :  { %5128 = vmatpush3.msk.msra.mxu0 %vm313_vm2, %v4613_v57 }
 0x127   :  { %5135 = vmatprep.subr.msk.mxu0 %vm313_vm2, %v4632_v58 }
 0x128   :  { %593 = vmatmul.mubr.f32.gmra.mxu0 %v4583_v59 }
 0x129   :  { %4592 = vmatprep.mubr.msk.f32.mxu0 %vm89_vm1, %v4586_v60 }
 0x12c   :  { %598 = vmatmul.mubr.f32.gmra.mxu0 %v4585_v61 }
 0x12d   :  { %4593 = vmatprep.mubr.msk.f32.mxu0 %vm89_vm1, %v4588_v62 }
 0x130   :  { %603 = vmatmul.mubr.f32.gmra.mxu0 %v4587_v63 }
 0x1ba   :  { %v5107_v23 = vpop.f32.mrf.mxu0  ;;  %v5115_v24 = vpop.f32.mrf.mxu1 }
 0x1bb   :  { %v6083_v25 = vadd.f32 %v5115_v24, %v5107_v23 }
 0x1bc   :  { %v383_v26 = vpop.f32.mrf.mxu0  ;;  %v483_v27 = vpop.f32.mrf.mxu1 }
 0x1bd   :  { %v6085_v28 = vadd.f32 %v483_v27, %v383_v26 }
 0x1c2   :  { %v5110_v29 = vpop.f32.mrf.mxu0 }
 0x1c3   :  { %v5118_v30 = vpop.f32.mrf.mxu1 }
 0x1c4   :  { %v6087_v31 = vadd.f32 %v5118_v30, %v5110_v29  ;;  %v6089_v32 = vpop.f32.mrf.mxu0 }
 0x1c5   :  { %v493_v59 = vpop.f32.mrf.mxu1 }
 0x1c6   :  { %v494_v23 = vadd.f32 %v493_v59, %v6089_v32 }
 0x1e4   :  { %v589_v33 = vpop.f32.mrf.mxu0 }
 0x1e5   :  { %5121 = vmatprep.mubr.msk.f32.mxu1 %vm300_vm3, %v589_v33 }
 0x1e6   :  { %v591_v34 = vpop.f32.mrf.mxu0 }
 0x1e8   :  { %v594_v35 = vpop.f32.mrf.mxu0 }
 0x1e9   :  { %5122 = vmatmul.mubr.msk.f32.vlgmr.msra.gmra.mxu1 %vm300_vm3, %v594_v35 }
 0x1ea   :  { %736 = vmatpush1.msra.mxu1 %v5744_v0  ;;  %v596_v36 = vpop.f32.mrf.mxu0 }
 0x1eb   :  { %737 = vmatprep.subr.mxu1 %v5643_v1 }
 0x1ec   :  { %738 = vmatpush1.msra.mxu1 %v5751_v2  ;;  %v599_v37 = vpop.f32.mrf.mxu0 }
 0x1ed   :  { %739 = vmatprep.subr.mxu1 %v5643_v1  ;;  %5124 = vmatprep.mubr.msk.f32.mxu1 %vm300_vm3, %v599_v37 }
 0x1ee   :  { %740 = vmatpush1.msra.mxu1 %v5760_v3  ;;  %v601_v38 = vpop.f32.mrf.mxu0 }
 0x1ef   :  { %741 = vmatprep.subr.mxu1 %v5643_v1 }
 0x1f0   :  { %742 = vmatpush1.msra.mxu1 %v5769_v4  ;;  %v604_v40 = vpop.f32.mrf.mxu0 }
 0x1f1   :  { %743 = vmatprep.subr.mxu1 %v5643_v1  ;;  %5125 = vmatmul.mubr.msk.f32.gmra.mxu1 %vm300_vm3, %v604_v40 }
 0x1f2   :  { %744 = vmatpush1.msra.mxu1 %v5778_v5  ;;  %v606_v41 = vpop.f32.mrf.mxu0  ;;  %4609 = vmatprep.mubr.msk.f32.mxu1 %vm89_vm1, %v4601_v39 }
 0x1f3   :  { %745 = vmatprep.subr.mxu1 %v5643_v1  ;;  %v4639_v41 = vld [vmem:[%s7461_s30 + $0x148] sm:$0xff] }
 0x1f4   :  { %746 = vmatpush1.msra.mxu1 %v5787_v6 }
 0x1f5   :  { %747 = vmatprep.subr.mxu1 %v5643_v1 }
 0x1f6   :  { %748 = vmatpush1.msra.mxu1 %v5796_v7 }
 0x1f7   :  { %749 = vmatprep.subr.mxu1 %v5643_v1 }
 0x1f8   :  { %750 = vmatpush1.msra.mxu1 %v5805_v8 }
 0x1f9   :  { %751 = vmatprep.subr.mxu1 %v5643_v1 }
 0x1fa   :  { %752 = vmatpush1.msra.mxu1 %v5814_v9 }
 0x1fb   :  { %753 = vmatprep.subr.mxu1 %v5643_v1 }
 0x1fc   :  { %754 = vmatpush1.msra.mxu1 %v5823_v10 }
 0x1fd   :  { %755 = vmatprep.subr.mxu1 %v5643_v1 }
 0x1fe   :  { %756 = vmatpush1.msra.mxu1 %v5832_v11 }
 0x1ff   :  { %757 = vmatprep.subr.mxu1 %v5643_v1 }
 0x200   :  { %758 = vmatpush1.msra.mxu1 %v5841_v12 }
 0x201   :  { %759 = vmatprep.subr.mxu1 %v5643_v1 }
 0x202   :  { %760 = vmatpush1.msra.mxu1 %v5850_v13 }
 0x203   :  { %761 = vmatprep.subr.mxu1 %v5643_v1 }
 0x204   :  { %762 = vmatpush1.msra.mxu1 %v5859_v14 }
 0x205   :  { %763 = vmatprep.subr.mxu1 %v5643_v1 }
 0x206   :  { %764 = vmatpush1.msra.mxu1 %v5868_v15 }
 0x207   :  { %765 = vmatprep.subr.mxu1 %v5643_v1 }
 0x208   :  { %766 = vmatpush1.msra.mxu1 %v5877_v16 }
 0x209   :  { %789 = vmatprep.subr.mxu1 %v5643_v1 }
 0x20a   :  { %4608 = vmatpush2.msk.msra.mxu1 %vm102_vm0, %v5886_v17 }
 0x20b   :  { %791 = vmatprep.subr.mxu1 %v5643_v1 }
 0x20c   :  { %792 = vmatpush2.msra.mxu1 %v5895_v18 }
 0x20d   :  { %793 = vmatprep.subr.mxu1 %v5643_v1 }
 0x20e   :  { %794 = vmatpush2.msra.mxu1 %v5906_v19 }
 0x20f   :  { %795 = vmatprep.subr.mxu1 %v5643_v1 }
 0x210   :  { %796 = vmatpush2.msra.mxu1 %v5915_v20 }
 0x211   :  { %797 = vmatprep.subr.mxu1 %v5643_v1 }
 0x212   :  { %798 = vmatpush2.msra.mxu1 %v5924_v21 }
 0x213   :  { %800 = vmatmul.mubr.f32.vlgmr.msra.gmra.mxu1 %v4600_v42  ;;  %947 = vmatprep.subr.mxu1 %v5643_v1 }
 0x214   :  { %948 = vmatpush1.msra.mxu1 %v5744_v0  ;;  %4610 = vmatprep.mubr.msk.f32.mxu1 %vm89_vm1, %v4603_v43 }
 0x215   :  { %949 = vmatprep.subr.mxu1 %v5643_v1 }
 0x216   :  { %950 = vmatpush1.msra.mxu1 %v5751_v2 }
 0x217   :  { %805 = vmatmul.mubr.f32.gmra.mxu1 %v4602_v44  ;;  %951 = vmatprep.subr.mxu1 %v5643_v1  ;;  %v4638_v44 = vld [vmem:[%s7461_s30 + $0x140] sm:$0xff] }
 0x218   :  { %952 = vmatpush1.msra.mxu1 %v5760_v3  ;;  %4611 = vmatprep.mubr.msk.f32.mxu1 %vm89_vm1, %v4605_v45  ;;  %v4641_v45 = vld [vmem:[%s7461_s30 + $0x158] sm:$0xff] }
 0x219   :  { %953 = vmatprep.subr.mxu1 %v5643_v1 }
 0x21a   :  { %954 = vmatpush1.msra.mxu1 %v5769_v4 }
 0x21b   :  { %810 = vmatmul.mubr.f32.gmra.mxu1 %v4604_v46  ;;  %955 = vmatprep.subr.mxu1 %v5643_v1  ;;  %v4640_v46 = vld [vmem:[%s7461_s30 + $0x150] sm:$0xff] }
 0x21c   :  { %956 = vmatpush1.msra.mxu1 %v5778_v5  ;;  %4612 = vmatprep.mubr.msk.f32.mxu1 %vm89_vm1, %v4607_v47  ;;  %v4643_v47 = vld [vmem:[%s7461_s30 + $0x168] sm:$0xff] }
 0x21d   :  { %957 = vmatprep.subr.mxu1 %v5643_v1 }
 0x21e   :  { %958 = vmatpush1.msra.mxu1 %v5787_v6 }
 0x21f   :  { %815 = vmatmul.mubr.f32.gmra.mxu1 %v4606_v48  ;;  %959 = vmatprep.subr.mxu1 %v5643_v1  ;;  %v4645_v48 = vld [vmem:[%s7461_s30 + $0x178] sm:$0xff] }
 0x220   :  { %960 = vmatpush1.msra.mxu1 %v5796_v7  ;;  %4628 = vmatprep.mubr.msk.f32.mxu1 %vm89_vm1, %v4620_v49 }
 0x221   :  { %961 = vmatprep.subr.mxu1 %v5643_v1 }
 0x222   :  { %962 = vmatpush1.msra.mxu1 %v5805_v8 }
 0x223   :  { %963 = vmatprep.subr.mxu1 %v5643_v1 }
 0x224   :  { %964 = vmatpush1.msra.mxu1 %v5814_v9 }
 0x225   :  { %965 = vmatprep.subr.mxu1 %v5643_v1 }
 0x226   :  { %966 = vmatpush1.msra.mxu1 %v5823_v10 }
 0x227   :  { %967 = vmatprep.subr.mxu1 %v5643_v1 }
 0x228   :  { %968 = vmatpush1.msra.mxu1 %v5832_v11 }
 0x229   :  { %969 = vmatprep.subr.mxu1 %v5643_v1 }
 0x22a   :  { %970 = vmatpush1.msra.mxu1 %v5841_v12 }
 0x22b   :  { %971 = vmatprep.subr.mxu1 %v5643_v1 }
 0x22c   :  { %972 = vmatpush1.msra.mxu1 %v5850_v13 }
 0x22d   :  { %973 = vmatprep.subr.mxu1 %v5643_v1 }
 0x22e   :  { %974 = vmatpush1.msra.mxu1 %v5859_v14 }
 0x22f   :  { %975 = vmatprep.subr.mxu1 %v5643_v1 }
 0x230   :  { %976 = vmatpush1.msra.mxu1 %v5868_v15 }
 0x231   :  { %977 = vmatprep.subr.mxu1 %v5643_v1 }
 0x232   :  { %978 = vmatpush1.msra.mxu1 %v5877_v16 }
 0x233   :  { %1001 = vmatprep.subr.mxu1 %v5643_v1 }
 0x234   :  { %4627 = vmatpush2.msk.msra.mxu1 %vm102_vm0, %v5886_v17 }
 0x235   :  { %1003 = vmatprep.subr.mxu1 %v5643_v1 }
 0x236   :  { %1004 = vmatpush2.msra.mxu1 %v5895_v18 }
 0x237   :  { %1005 = vmatprep.subr.mxu1 %v5643_v1 }
 0x238   :  { %1006 = vmatpush2.msra.mxu1 %v5906_v19 }
 0x239   :  { %1007 = vmatprep.subr.mxu1 %v5643_v1 }
 0x23a   :  { %1008 = vmatpush2.msra.mxu1 %v5915_v20 }
 0x23b   :  { %1009 = vmatprep.subr.mxu1 %v5643_v1 }
 0x23c   :  { %1010 = vmatpush2.msra.mxu1 %v5924_v21 }
 0x23d   :  { %1012 = vmatmul.mubr.f32.vlgmr.msra.gmra.mxu1 %v4619_v50 }
 0x23e   :  { %4629 = vmatprep.mubr.msk.f32.mxu1 %vm89_vm1, %v4622_v51 }
 0x241   :  { %1017 = vmatmul.mubr.f32.gmra.mxu1 %v4621_v52 }
 0x242   :  { %4630 = vmatprep.mubr.msk.f32.mxu1 %vm89_vm1, %v4624_v53 }
 0x245   :  { %1022 = vmatmul.mubr.f32.gmra.mxu1 %v4623_v54 }
 0x246   :  { %4631 = vmatprep.mubr.msk.f32.mxu1 %vm89_vm1, %v4626_v55 }
 0x249   :  { %1027 = vmatmul.mubr.f32.gmra.mxu1 %v4625_v56 }
 0x2a9   :  { %v5123_v60 = vpop.f32.mrf.mxu1 }
 0x2aa   :  { %v6246_v61 = vadd.f32 %v5123_v60, %v6083_v25 }
 0x2ab   :  { %v691_v62 = vpop.f32.mrf.mxu1 }
 0x2ac   :  { %v6249_v63 = vadd.f32 %v691_v62, %v6085_v28 }
 0x2b1   :  { %v5126_v22 = vpop.f32.mrf.mxu1 }
 0x2b2   :  { %v6253_v24 = vadd.f32 %v5126_v22, %v6087_v31 }
 0x2b3   :  { %v701_v26 = vpop.f32.mrf.mxu1 }
 0x2b4   :  { %v6255_v27 = vadd.f32 %v701_v26, %v494_v23  ;;  %v6440_v26 = vld [vmem:[%s7460_s29 + $0x78] sm:$0xff] }
 0x2d3   :  { %v801_v29 = vpop.f32.mrf.mxu1 }
 0x2d4   :  { %5129 = vmatprep.mubr.msk.f32.mxu0 %vm300_vm3, %v801_v29  ;;  %v6447_v29 = vld [vmem:[%s7460_s29 + $0x70] sm:$0xff] }
 0x2d5   :  { %v803_v30 = vpop.f32.mrf.mxu1 }
 0x2d7   :  { %v806_v33 = vpop.f32.mrf.mxu1 }
 0x2d8   :  { %5130 = vmatmul.mubr.msk.f32.vlgmr.msra.gmra.mxu0 %vm300_vm3, %v806_v33  ;;  %v6455_v33 = vld [vmem:[%s7460_s29 + $0x68] sm:$0xff] }
 0x2d9   :  { %v808_v25 = vpop.f32.mrf.mxu1  ;;  %5136 = vmatpush3.msk.msra.mxu0 %vm313_vm2, %v4632_v58 }
 0x2da   :  { %1159 = vmatprep.subr.mxu0 %v5643_v1 }
 0x2db   :  { %v811_v28 = vpop.f32.mrf.mxu1 }
 0x2dc   :  { %5132 = vmatprep.mubr.msk.f32.mxu0 %vm300_vm3, %v811_v28  ;;  %v4677_v28 = vld [vmem:[%s7461_s30 + $0x1c8] sm:$0xff] }
 0x2dd   :  { %v813_v31 = vpop.f32.mrf.mxu1 }
 0x2de   :  { %v6465_v31 = vld [vmem:[%s7460_s29 + $0x60] sm:$0xff] }
 0x2df   :  { %v816_v32 = vpop.f32.mrf.mxu1 }
 0x2e0   :  { %5133 = vmatmul.mubr.msk.f32.gmra.mxu0 %vm300_vm3, %v816_v32 }
 0x2e1   :  { %v818_v34 = vpop.f32.mrf.mxu1 }
 0x2e2   :  { %v6473_v34 = vld [vmem:[%s7460_s29 + $0x58] sm:$0xff] }
 0x2fd   :  { %v1013_v35 = vpop.f32.mrf.mxu1 }
 0x2fe   :  { %5137 = vmatprep.mubr.msk.f32.mxu0 %vm300_vm3, %v1013_v35 }
 0x2ff   :  { %v1015_v36 = vpop.f32.mrf.mxu1 }
 0x300   :  { %v6481_v36 = vld [vmem:[%s7460_s29 + $0x50] sm:$0xff] }
 0x301   :  { %v1018_v37 = vpop.f32.mrf.mxu1 }
 0x302   :  { %5138 = vmatmul.mubr.msk.f32.vlgmr.msra.gmra.mxu0 %vm300_vm3, %v1018_v37  ;;  %v6488_v37 = vld [vmem:[%s7460_s29 + $0x48] sm:$0xff] }
 0x303   :  { %1160 = vmatpush1.msra.mxu0 %v5744_v0  ;;  %v1020_v38 = vpop.f32.mrf.mxu1 }
 0x304   :  { %1161 = vmatprep.subr.mxu0 %v5643_v1  ;;  %v6495_v38 = vld [vmem:[%s7460_s29 + $0x40] sm:$0xff] }
 0x305   :  { %1162 = vmatpush1.msra.mxu0 %v5751_v2  ;;  %v1023_v39 = vpop.f32.mrf.mxu1 }
 0x306   :  { %1163 = vmatprep.subr.mxu0 %v5643_v1  ;;  %5140 = vmatprep.mubr.msk.f32.mxu0 %vm300_vm3, %v1023_v39  ;;  %v6502_v39 = vld [vmem:[%s7460_s29 + $0x38] sm:$0xff] }
 0x307   :  { %1164 = vmatpush1.msra.mxu0 %v5760_v3  ;;  %v1025_v40 = vpop.f32.mrf.mxu1 }
 0x308   :  { %1165 = vmatprep.subr.mxu0 %v5643_v1  ;;  %v6509_v40 = vld [vmem:[%s7460_s29 + $0x30] sm:$0xff] }
 0x309   :  { %1166 = vmatpush1.msra.mxu0 %v5769_v4  ;;  %v1028_v42 = vpop.f32.mrf.mxu1 }
 0x30a   :  { %1167 = vmatprep.subr.mxu0 %v5643_v1  ;;  %5141 = vmatmul.mubr.msk.f32.gmra.mxu0 %vm300_vm3, %v1028_v42  ;;  %v6523_v42 = vld [vmem:[%s7460_s29 + $0x20] sm:$0xff] }
 0x30b   :  { %1168 = vmatpush1.msra.mxu0 %v5778_v5  ;;  %v1030_v43 = vpop.f32.mrf.mxu1  ;;  %4647 = vmatprep.mubr.msk.f32.mxu0 %vm89_vm1, %v4639_v41  ;;  %v6516_v41 = vld [vmem:[%s7460_s29 + $0x28] sm:$0xff] }
 0x30c   :  { %1169 = vmatprep.subr.mxu0 %v5643_v1  ;;  %v6530_v43 = vld [vmem:[%s7460_s29 + $0x18] sm:$0xff] }
 0x30d   :  { %1170 = vmatpush1.msra.mxu0 %v5787_v6 }
 0x30e   :  { %1171 = vmatprep.subr.mxu0 %v5643_v1 }
 0x30f   :  { %1172 = vmatpush1.msra.mxu0 %v5796_v7 }
 0x310   :  { %1173 = vmatprep.subr.mxu0 %v5643_v1 }
 0x311   :  { %1174 = vmatpush1.msra.mxu0 %v5805_v8 }
 0x312   :  { %1175 = vmatprep.subr.mxu0 %v5643_v1 }
 0x313   :  { %1176 = vmatpush1.msra.mxu0 %v5814_v9 }
 0x314   :  { %1177 = vmatprep.subr.mxu0 %v5643_v1 }
 0x315   :  { %1178 = vmatpush1.msra.mxu0 %v5823_v10 }
 0x316   :  { %1179 = vmatprep.subr.mxu0 %v5643_v1 }
 0x317   :  { %1180 = vmatpush1.msra.mxu0 %v5832_v11 }
 0x318   :  { %1181 = vmatprep.subr.mxu0 %v5643_v1 }
 0x319   :  { %1182 = vmatpush1.msra.mxu0 %v5841_v12 }
 0x31a   :  { %1183 = vmatprep.subr.mxu0 %v5643_v1 }
 0x31b   :  { %1184 = vmatpush1.msra.mxu0 %v5850_v13 }
 0x31c   :  { %1185 = vmatprep.subr.mxu0 %v5643_v1 }
 0x31d   :  { %1186 = vmatpush1.msra.mxu0 %v5859_v14 }
 0x31e   :  { %1187 = vmatprep.subr.mxu0 %v5643_v1 }
 0x31f   :  { %1188 = vmatpush1.msra.mxu0 %v5868_v15 }
 0x320   :  { %1189 = vmatprep.subr.mxu0 %v5643_v1 }
 0x321   :  { %1190 = vmatpush1.msra.mxu0 %v5877_v16 }
 0x322   :  { %1213 = vmatprep.subr.mxu0 %v5643_v1 }
 0x323   :  { %4646 = vmatpush2.msk.msra.mxu0 %vm102_vm0, %v5886_v17 }
 0x324   :  { %1215 = vmatprep.subr.mxu0 %v5643_v1 }
 0x325   :  { %1216 = vmatpush2.msra.mxu0 %v5895_v18 }
 0x326   :  { %1217 = vmatprep.subr.mxu0 %v5643_v1 }
 0x327   :  { %1218 = vmatpush2.msra.mxu0 %v5906_v19 }
 0x328   :  { %1219 = vmatprep.subr.mxu0 %v5643_v1 }
 0x329   :  { %1220 = vmatpush2.msra.mxu0 %v5915_v20 }
 0x32a   :  { %1221 = vmatprep.subr.mxu0 %v5643_v1 }
 0x32b   :  { %1222 = vmatpush2.msra.mxu0 %v5924_v21 }
 0x32c   :  { %1224 = vmatmul.mubr.f32.vlgmr.msra.gmra.mxu0 %v4638_v44  ;;  %1371 = vmatprep.subr.mxu0 %v5643_v1  ;;  %v6537_v44 = vld [vmem:[%s7460_s29 + $0x10] sm:$0xff] }
 0x32d   :  { %1372 = vmatpush1.msra.mxu0 %v5744_v0  ;;  %4648 = vmatprep.mubr.msk.f32.mxu0 %vm89_vm1, %v4641_v45  ;;  %v4642_v0 = vld [vmem:[%s7461_s30 + $0x160] sm:$0xff]  ;;  %v6544_v45 = vld [vmem:[%s7460_s29 + $0x8] sm:$0xff] }
 0x32e   :  { %1373 = vmatprep.subr.mxu0 %v5643_v1 }
 0x32f   :  { %1374 = vmatpush1.msra.mxu0 %v5751_v2  ;;  %v4644_v2 = vld [vmem:[%s7461_s30 + $0x170] sm:$0xff] }
 0x330   :  { %1229 = vmatmul.mubr.f32.gmra.mxu0 %v4640_v46  ;;  %1375 = vmatprep.subr.mxu0 %v5643_v1  ;;  %v6551_v46 = vld [vmem:[%s7460_s29] sm:$0xff] }
 0x331   :  { %1376 = vmatpush1.msra.mxu0 %v5760_v3  ;;  %4649 = vmatprep.mubr.msk.f32.mxu0 %vm89_vm1, %v4643_v47  ;;  %v4658_v3 = vld [vmem:[%s7461_s30 + $0x188] sm:$0xff]  ;;  %v6558_v47 = vld [vmem:[%s7460_s29 + $0xa0] sm:$0x3] }
 0x332   :  { %1377 = vmatprep.subr.mxu0 %v5643_v1 }
 0x333   :  { %1378 = vmatpush1.msra.mxu0 %v5769_v4  ;;  %v4657_v4 = vld [vmem:[%s7461_s30 + $0x180] sm:$0xff] }
 0x334   :  { %1234 = vmatmul.mubr.f32.gmra.mxu0 %v4642_v0  ;;  %1379 = vmatprep.subr.mxu0 %v5643_v1  ;;  %v5617_v0 = vld [vmem:[%s7460_s29 + $0x98] sm:$0xff] }
 0x335   :  { %1380 = vmatpush1.msra.mxu0 %v5778_v5  ;;  %4650 = vmatprep.mubr.msk.f32.mxu0 %vm89_vm1, %v4645_v48  ;;  %v4660_v5 = vld [vmem:[%s7461_s30 + $0x198] sm:$0xff]  ;;  %v5618_v48 = vld [vmem:[%s7460_s29 + $0x90] sm:$0xff] }
 0x336   :  { %1381 = vmatprep.subr.mxu0 %v5643_v1 }
 0x337   :  { %1382 = vmatpush1.msra.mxu0 %v5787_v6  ;;  %v4659_v6 = vld [vmem:[%s7461_s30 + $0x190] sm:$0xff] }
 0x338   :  { %1239 = vmatmul.mubr.f32.gmra.mxu0 %v4644_v2  ;;  %1383 = vmatprep.subr.mxu0 %v5643_v1  ;;  %v5619_v2 = vld [vmem:[%s7460_s29 + $0x88] sm:$0xff] }
 0x339   :  { %1384 = vmatpush1.msra.mxu0 %v5796_v7  ;;  %4666 = vmatprep.mubr.msk.f32.mxu0 %vm89_vm1, %v4658_v3  ;;  %v4662_v7 = vld [vmem:[%s7461_s30 + $0x1a8] sm:$0xff]  ;;  %v4676_v3 = vld [vmem:[%s7461_s30 + $0x1c0] sm:$0xff] }
 0x33a   :  { %1385 = vmatprep.subr.mxu0 %v5643_v1 }
 0x33b   :  { %1386 = vmatpush1.msra.mxu0 %v5805_v8  ;;  %v4661_v8 = vld [vmem:[%s7461_s30 + $0x1a0] sm:$0xff] }
 0x33c   :  { %1387 = vmatprep.subr.mxu0 %v5643_v1 }
 0x33d   :  { %1388 = vmatpush1.msra.mxu0 %v5814_v9  ;;  %v4664_v9 = vld [vmem:[%s7461_s30 + $0x1b8] sm:$0xff] }
 0x33e   :  { %1389 = vmatprep.subr.mxu0 %v5643_v1 }
 0x33f   :  { %1390 = vmatpush1.msra.mxu0 %v5823_v10  ;;  %v4663_v10 = vld [vmem:[%s7461_s30 + $0x1b0] sm:$0xff] }
 0x340   :  { %1391 = vmatprep.subr.mxu0 %v5643_v1 }
 0x341   :  { %1392 = vmatpush1.msra.mxu0 %v5832_v11  ;;  %v4651_v11 = vld [vmem:[%s7439_s3 + $0x14] sm:$0x7] }
 0x342   :  { %1393 = vmatprep.subr.mxu0 %v5643_v1  ;;  %5143 = vmatprep.subr.msk.mxu1 %vm313_vm2, %v4651_v11 }
 0x343   :  { %1394 = vmatpush1.msra.mxu0 %v5841_v12  ;;  %5144 = vmatpush3.msk.msra.mxu1 %vm313_vm2, %v4651_v11  ;;  %v4670_v12 = vld [vmem:[%s7439_s3 + $0x18] sm:$0x7]  ;;  %v4696_v11 = vld [vmem:[%s7461_s30 + $0x208] sm:$0xff] }
 0x344   :  { %1395 = vmatprep.subr.mxu0 %v5643_v1  ;;  %5151 = vmatprep.subr.msk.mxu1 %vm313_vm2, %v4670_v12 }
 0x345   :  { %1396 = vmatpush1.msra.mxu0 %v5850_v13 }
 0x346   :  { %1397 = vmatprep.subr.mxu0 %v5643_v1 }
 0x347   :  { %1398 = vmatpush1.msra.mxu0 %v5859_v14 }
 0x348   :  { %1399 = vmatprep.subr.mxu0 %v5643_v1 }
 0x349   :  { %1400 = vmatpush1.msra.mxu0 %v5868_v15 }
 0x34a   :  { %1401 = vmatprep.subr.mxu0 %v5643_v1 }
 0x34b   :  { %1402 = vmatpush1.msra.mxu0 %v5877_v16 }
 0x34c   :  { %1425 = vmatprep.subr.mxu0 %v5643_v1 }
 0x34d   :  { %4665 = vmatpush2.msk.msra.mxu0 %vm102_vm0, %v5886_v17 }
 0x34e   :  { %1427 = vmatprep.subr.mxu0 %v5643_v1 }
 0x34f   :  { %1428 = vmatpush2.msra.mxu0 %v5895_v18 }
 0x350   :  { %1429 = vmatprep.subr.mxu0 %v5643_v1 }
 0x351   :  { %1430 = vmatpush2.msra.mxu0 %v5906_v19 }
 0x352   :  { %1431 = vmatprep.subr.mxu0 %v5643_v1 }
 0x353   :  { %1432 = vmatpush2.msra.mxu0 %v5915_v20 }
 0x354   :  { %1433 = vmatprep.subr.mxu0 %v5643_v1 }
 0x355   :  { %1434 = vmatpush2.msra.mxu0 %v5924_v21 }
 0x356   :  { %1436 = vmatmul.mubr.f32.vlgmr.msra.gmra.mxu0 %v4657_v4  ;;  %v4679_v4 = vld [vmem:[%s7461_s30 + $0x1d8] sm:$0xff] }
 0x357   :  { %4667 = vmatprep.mubr.msk.f32.mxu0 %vm89_vm1, %v4660_v5  ;;  %v5620_v5 = vld [vmem:[%s7460_s29 + $0x80] sm:$0xff] }
 0x35a   :  { %1441 = vmatmul.mubr.f32.gmra.mxu0 %v4659_v6  ;;  %v4678_v6 = vld [vmem:[%s7461_s30 + $0x1d0] sm:$0xff] }
 0x35b   :  { %4668 = vmatprep.mubr.msk.f32.mxu0 %vm89_vm1, %v4662_v7  ;;  %v4681_v7 = vld [vmem:[%s7461_s30 + $0x1e8] sm:$0xff] }
 0x35e   :  { %1446 = vmatmul.mubr.f32.gmra.mxu0 %v4661_v8  ;;  %v4680_v8 = vld [vmem:[%s7461_s30 + $0x1e0] sm:$0xff] }
 0x35f   :  { %4669 = vmatprep.mubr.msk.f32.mxu0 %vm89_vm1, %v4664_v9  ;;  %v4683_v9 = vld [vmem:[%s7461_s30 + $0x1f8] sm:$0xff] }
 0x362   :  { %1451 = vmatmul.mubr.f32.gmra.mxu0 %v4663_v10  ;;  %v4682_v10 = vld [vmem:[%s7461_s30 + $0x1f0] sm:$0xff] }
 0x398   :  { %v5131_v13 = vpop.f32.mrf.mxu0 }
 0x399   :  { %v923_v14 = vadd.f32 %v5131_v13, %v6246_v61  ;;  %v4698_v13 = vld [vmem:[%s7461_s30 + $0x218] sm:$0xff] }
 0x39a   :  { %v903_v15 = vpop.f32.mrf.mxu0 }
 0x39b   :  { %v922_v16 = vadd.f32 %v903_v15, %v6249_v63  ;;  %v4700_v15 = vld [vmem:[%s7461_s30 + $0x228] sm:$0xff] }
 0x3a0   :  { %v5134_v17 = vpop.f32.mrf.mxu0 }
 0x3a1   :  { %v925_v18 = vadd.f32 %v5134_v17, %v6253_v24  ;;  %v4702_v17 = vld [vmem:[%s7461_s30 + $0x238] sm:$0xff] }
 0x3a2   :  { %v913_v19 = vpop.f32.mrf.mxu0 }
 0x3a3   :  { %v924_v20 = vadd.f32 %v913_v19, %v6255_v27  ;;  %v4689_v19 = vld [vmem:[%s7439_s3 + $0x1c] sm:$0x7] }
 0x3a4   :  { %5159 = vmatprep.subr.msk.mxu0 %vm313_vm2, %v4689_v19 }
 0x3a5   :  { %5160 = vmatpush3.msk.msra.mxu0 %vm313_vm2, %v4689_v19  ;;  %v2002_v19 = vld [vmem:[%s7441_s5 + $0x8] sm:$0xff] }
 0x3c2   :  { %v5139_v21 = vpop.f32.mrf.mxu0 }
 0x3c3   :  { %v6421_v49 = vadd.f32 %v5139_v21, %v923_v14  ;;  %v4697_v14 = vld [vmem:[%s7461_s30 + $0x210] sm:$0xff]  ;;  %v4708_v21 = vld [vmem:[%s7439_s3 + $0x20] sm:$0x7] }
 0x3c4   :  { %v1115_v50 = vpop.f32.mrf.mxu0  ;;  %5167 = vmatprep.subr.msk.mxu0 %vm313_vm2, %v4708_v21 }
 0x3c5   :  { %v6423_v51 = vadd.f32 %v1115_v50, %v922_v16  ;;  %v4699_v16 = vld [vmem:[%s7461_s30 + $0x220] sm:$0xff] }
 0x3ca   :  { %v5142_v52 = vpop.f32.mrf.mxu0 }
 0x3cb   :  { %v6425_v53 = vadd.f32 %v5142_v52, %v925_v18  ;;  %v4701_v18 = vld [vmem:[%s7461_s30 + $0x230] sm:$0xff] }
 0x3cc   :  { %v1125_v54 = vpop.f32.mrf.mxu0 }
 0x3cd   :  { %v6427_v55 = vadd.f32 %v1125_v54, %v924_v20 }
 0x3ec   :  { %v1225_v56 = vpop.f32.mrf.mxu0 }
 0x3ed   :  { %5145 = vmatprep.mubr.msk.f32.mxu1 %vm300_vm3, %v1225_v56 }
 0x3ee   :  { %v1227_v57 = vpop.f32.mrf.mxu0 }
 0x3f0   :  { %v1230_v58 = vpop.f32.mrf.mxu0 }
 0x3f1   :  { %5146 = vmatmul.mubr.msk.f32.vlgmr.msra.gmra.mxu1 %vm300_vm3, %v1230_v58 }
 0x3f2   :  { %v1232_v59 = vpop.f32.mrf.mxu0  ;;  %5152 = vmatpush3.msk.msra.mxu1 %vm313_vm2, %v4670_v12  ;;  %v4695_v12 = vld [vmem:[%s7461_s30 + $0x200] sm:$0xff] }
 0x3f3   :  { %1583 = vmatprep.subr.mxu1 %v5643_v1 }
 0x3f4   :  { %v1235_v60 = vpop.f32.mrf.mxu0 }
 0x3f5   :  { %5148 = vmatprep.mubr.msk.f32.mxu1 %vm300_vm3, %v1235_v60 }
 0x3f6   :  { %v1237_v61 = vpop.f32.mrf.mxu0 }
 0x3f8   :  { %v1240_v62 = vpop.f32.mrf.mxu0 }
 0x3f9   :  { %5149 = vmatmul.mubr.msk.f32.gmra.mxu1 %vm300_vm3, %v1240_v62 }
 0x3fa   :  { %v1242_v63 = vpop.f32.mrf.mxu0 }
 0x416   :  { %v1437_v22 = vpop.f32.mrf.mxu0 }
 0x417   :  { %5153 = vmatprep.mubr.msk.f32.mxu1 %vm300_vm3, %v1437_v22 }
 0x418   :  { %v1439_v23 = vpop.f32.mrf.mxu0 }
 0x41a   :  { %v1442_v24 = vpop.f32.mrf.mxu0 }
 0x41b   :  { %5154 = vmatmul.mubr.msk.f32.vlgmr.msra.gmra.mxu1 %vm300_vm3, %v1442_v24 }
 0x41c   :  { %1584 = vmatpush1.msra.mxu1 %v6440_v26  ;;  %v1444_v27 = vpop.f32.mrf.mxu0 }
 0x41d   :  { %1585 = vmatprep.subr.mxu1 %v5643_v1 }
 0x41e   :  { %1586 = vmatpush1.msra.mxu1 %v6447_v29  ;;  %v1447_v30 = vpop.f32.mrf.mxu0 }
 0x41f   :  { %1587 = vmatprep.subr.mxu1 %v5643_v1  ;;  %5156 = vmatprep.mubr.msk.f32.mxu1 %vm300_vm3, %v1447_v30 }
 0x420   :  { %1588 = vmatpush1.msra.mxu1 %v6455_v33  ;;  %v1449_v25 = vpop.f32.mrf.mxu0 }
 0x421   :  { %1589 = vmatprep.subr.mxu1 %v5643_v1 }
 0x422   :  { %1590 = vmatpush1.msra.mxu1 %v6465_v31  ;;  %v1452_v32 = vpop.f32.mrf.mxu0 }
 0x423   :  { %1591 = vmatprep.subr.mxu1 %v5643_v1  ;;  %5157 = vmatmul.mubr.msk.f32.gmra.mxu1 %vm300_vm3, %v1452_v32 }
 0x424   :  { %1592 = vmatpush1.msra.mxu1 %v6473_v34  ;;  %v1454_v35 = vpop.f32.mrf.mxu0  ;;  %4685 = vmatprep.mubr.msk.f32.mxu1 %vm89_vm1, %v4677_v28 }
 0x425   :  { %1593 = vmatprep.subr.mxu1 %v5643_v1 }
 0x426   :  { %1594 = vmatpush1.msra.mxu1 %v6481_v36 }
 0x427   :  { %1595 = vmatprep.subr.mxu1 %v5643_v1 }
 0x428   :  { %1596 = vmatpush1.msra.mxu1 %v6488_v37 }
 0x429   :  { %1597 = vmatprep.subr.mxu1 %v5643_v1 }
 0x42a   :  { %1598 = vmatpush1.msra.mxu1 %v6495_v38 }
 0x42b   :  { %1599 = vmatprep.subr.mxu1 %v5643_v1 }
 0x42c   :  { %1600 = vmatpush1.msra.mxu1 %v6502_v39 }
 0x42d   :  { %1601 = vmatprep.subr.mxu1 %v5643_v1 }
 0x42e   :  { %1602 = vmatpush1.msra.mxu1 %v6509_v40 }
 0x42f   :  { %1603 = vmatprep.subr.mxu1 %v5643_v1 }
 0x430   :  { %1604 = vmatpush1.msra.mxu1 %v6516_v41 }
 0x431   :  { %1605 = vmatprep.subr.mxu1 %v5643_v1 }
 0x432   :  { %1606 = vmatpush1.msra.mxu1 %v6523_v42 }
 0x433   :  { %1607 = vmatprep.subr.mxu1 %v5643_v1 }
 0x434   :  { %1608 = vmatpush1.msra.mxu1 %v6530_v43 }
 0x435   :  { %1609 = vmatprep.subr.mxu1 %v5643_v1 }
 0x436   :  { %1610 = vmatpush1.msra.mxu1 %v6537_v44 }
 0x437   :  { %1611 = vmatprep.subr.mxu1 %v5643_v1 }
 0x438   :  { %1612 = vmatpush1.msra.mxu1 %v6544_v45 }
 0x439   :  { %1613 = vmatprep.subr.mxu1 %v5643_v1 }
 0x43a   :  { %1614 = vmatpush1.msra.mxu1 %v6551_v46 }
 0x43b   :  { %1637 = vmatprep.subr.mxu1 %v5643_v1 }
 0x43c   :  { %4684 = vmatpush2.msk.msra.mxu1 %vm102_vm0, %v6558_v47 }
 0x43d   :  { %1639 = vmatprep.subr.mxu1 %v5643_v1 }
 0x43e   :  { %1640 = vmatpush2.msra.mxu1 %v5617_v0 }
 0x43f   :  { %1641 = vmatprep.subr.mxu1 %v5643_v1 }
 0x440   :  { %1642 = vmatpush2.msra.mxu1 %v5618_v48 }
 0x441   :  { %1643 = vmatprep.subr.mxu1 %v5643_v1 }
 0x442   :  { %1644 = vmatpush2.msra.mxu1 %v5619_v2 }
 0x443   :  { %1645 = vmatprep.subr.mxu1 %v5643_v1 }
 0x444   :  { %1646 = vmatpush2.msra.mxu1 %v5620_v5 }
 0x445   :  { %1648 = vmatmul.mubr.f32.vlgmr.msra.gmra.mxu1 %v4676_v3  ;;  %1795 = vmatprep.subr.mxu1 %v5643_v1 }
 0x446   :  { %1796 = vmatpush1.msra.mxu1 %v6440_v26  ;;  %4686 = vmatprep.mubr.msk.f32.mxu1 %vm89_vm1, %v4679_v4 }
 0x447   :  { %1797 = vmatprep.subr.mxu1 %v5643_v1 }
 0x448   :  { %1798 = vmatpush1.msra.mxu1 %v6447_v29 }
 0x449   :  { %1653 = vmatmul.mubr.f32.gmra.mxu1 %v4678_v6  ;;  %1799 = vmatprep.subr.mxu1 %v5643_v1  ;;  %v4714_v6 = vld [vmem:[%s7440_s4] ss:$0 sm:$0xff] }
 0x44a   :  { %1800 = vmatpush1.msra.mxu1 %v6455_v33  ;;  %4687 = vmatprep.mubr.msk.f32.mxu1 %vm89_vm1, %v4681_v7 }
 0x44b   :  { %1801 = vmatprep.subr.mxu1 %v5643_v1 }
 0x44c   :  { %1802 = vmatpush1.msra.mxu1 %v6465_v31 }
 0x44d   :  { %1658 = vmatmul.mubr.f32.gmra.mxu1 %v4680_v8  ;;  %1803 = vmatprep.subr.mxu1 %v5643_v1 }
 0x44e   :  { %1804 = vmatpush1.msra.mxu1 %v6473_v34  ;;  %4688 = vmatprep.mubr.msk.f32.mxu1 %vm89_vm1, %v4683_v9 }
 0x44f   :  { %1805 = vmatprep.subr.mxu1 %v5643_v1 }
 0x450   :  { %1806 = vmatpush1.msra.mxu1 %v6481_v36 }
 0x451   :  { %1663 = vmatmul.mubr.f32.gmra.mxu1 %v4682_v10  ;;  %1807 = vmatprep.subr.mxu1 %v5643_v1 }
 0x452   :  { %1808 = vmatpush1.msra.mxu1 %v6488_v37  ;;  %4704 = vmatprep.mubr.msk.f32.mxu1 %vm89_vm1, %v4696_v11 }
 0x453   :  { %1809 = vmatprep.subr.mxu1 %v5643_v1 }
 0x454   :  { %1810 = vmatpush1.msra.mxu1 %v6495_v38  ;;  %v2097_v38 = vld [vmem:[%s7442_s6 + $0x18] sm:$0xff] }
 0x455   :  { %1811 = vmatprep.subr.mxu1 %v5643_v1 }
 0x456   :  { %1812 = vmatpush1.msra.mxu1 %v6502_v39  ;;  %v2096_v39 = vld [vmem:[%s7442_s6 + $0x10] sm:$0xff] }
 0x457   :  { %1813 = vmatprep.subr.mxu1 %v5643_v1 }
 0x458   :  { %1814 = vmatpush1.msra.mxu1 %v6509_v40  ;;  %v2095_v40 = vld [vmem:[%s7442_s6 + $0x8] sm:$0xff] }
 0x459   :  { %1815 = vmatprep.subr.mxu1 %v5643_v1 }
 0x45a   :  { %1816 = vmatpush1.msra.mxu1 %v6516_v41 }
 0x45b   :  { %1817 = vmatprep.subr.mxu1 %v5643_v1 }
 0x45c   :  { %1818 = vmatpush1.msra.mxu1 %v6523_v42 }
 0x45d   :  { %1819 = vmatprep.subr.mxu1 %v5643_v1 }
 0x45e   :  { %1820 = vmatpush1.msra.mxu1 %v6530_v43 }
 0x45f   :  { %1821 = vmatprep.subr.mxu1 %v5643_v1 }
 0x460   :  { %1822 = vmatpush1.msra.mxu1 %v6537_v44 }
 0x461   :  { %1823 = vmatprep.subr.mxu1 %v5643_v1 }
 0x462   :  { %1824 = vmatpush1.msra.mxu1 %v6544_v45 }
 0x463   :  { %1825 = vmatprep.subr.mxu1 %v5643_v1 }
 0x464   :  { %1826 = vmatpush1.msra.mxu1 %v6551_v46 }
 0x465   :  { %1849 = vmatprep.subr.mxu1 %v5643_v1 }
 0x466   :  { %4703 = vmatpush2.msk.msra.mxu1 %vm102_vm0, %v6558_v47 }
 0x467   :  { %1851 = vmatprep.subr.mxu1 %v5643_v1 }
 0x468   :  { %1852 = vmatpush2.msra.mxu1 %v5617_v0 }
 0x469   :  { %1853 = vmatprep.subr.mxu1 %v5643_v1 }
 0x46a   :  { %1854 = vmatpush2.msra.mxu1 %v5618_v48 }
 0x46b   :  { %1855 = vmatprep.subr.mxu1 %v5643_v1 }
 0x46c   :  { %1856 = vmatpush2.msra.mxu1 %v5619_v2 }
 0x46d   :  { %1857 = vmatprep.subr.mxu1 %v5643_v1 }
 0x46e   :  { %1858 = vmatpush2.msra.mxu1 %v5620_v5 }
 0x46f   :  { %1860 = vmatmul.mubr.f32.vlgmr.msra.gmra.mxu1 %v4695_v12  ;;  %5226 = vmatprep.subr.mxu1 %v5643_v1 }
 0x470   :  { %4705 = vmatprep.mubr.msk.f32.mxu1 %vm89_vm1, %v4698_v13  ;;  %5227 = vmatpush3.msra.mxu1 %v2097_v38 }
 0x471   :  { %5228 = vmatprep.subr.mxu1 %v5643_v1 }
 0x472   :  { %5229 = vmatpush3.msra.mxu1 %v2096_v39 }
 0x473   :  { %1865 = vmatmul.mubr.f32.gmra.mxu1 %v4697_v14  ;;  %5230 = vmatprep.subr.mxu1 %v5643_v1 }
 0x474   :  { %4706 = vmatprep.mubr.msk.f32.mxu1 %vm89_vm1, %v4700_v15  ;;  %5231 = vmatpush3.msra.mxu1 %v2095_v40 }
 0x475   :  { %5232 = vmatprep.subr.mxu1 %v5643_v1 }
 0x477   :  { %1870 = vmatmul.mubr.f32.gmra.mxu1 %v4699_v16 }
 0x478   :  { %4707 = vmatprep.mubr.msk.f32.mxu1 %vm89_vm1, %v4702_v17 }
 0x47b   :  { %1875 = vmatmul.mubr.f32.gmra.mxu1 %v4701_v18  ;;  %v2001_v18 = vld [vmem:[%s7441_s5] sm:$0xff] }
 0x47c   :  { %5234 = vmatprep.mubr.msk.f32.mxu1 %vm5644_vm4, %v5643_v1 }
 0x4b1   :  { %v5147_v20 = vpop.f32.mrf.mxu1 }
 0x4b2   :  { %v1347_v50 = vadd.f32 %v5147_v20, %v6421_v49  ;;  %v2003_v20 = vld [vmem:[%s7441_s5 + $0x10] sm:$0x3] }
 0x4b3   :  { %v1327_v52 = vpop.f32.mrf.mxu1 }
 0x4b4   :  { %v1346_v54 = vadd.f32 %v1327_v52, %v6423_v51  ;;  %v4720_v52 = vld [vmem:[%s7441_s5 + $0x28] sm:$0x3] }
 0x4b9   :  { %v5150_v56 = vpop.f32.mrf.mxu1 }
 0x4ba   :  { %v1349_v57 = vadd.f32 %v5150_v56, %v6425_v53  ;;  %v4727_v56 = vld [vmem:[%s7442_s6 + $0x38] sm:$0xff] }
 0x4bb   :  { %v1337_v58 = vpop.f32.mrf.mxu1 }
 0x4bc   :  { %v1348_v59 = vadd.f32 %v1337_v58, %v6427_v55  ;;  %v4725_v58 = vld [vmem:[%s7442_s6 + $0x28] sm:$0xff] }
 0x4db   :  { %v5155_v60 = vpop.f32.mrf.mxu1 }
 0x4dc   :  { %v1559_v61 = vadd.f32 %v5155_v60, %v1347_v50  ;;  %v4719_v50 = vld [vmem:[%s7441_s5 + $0x20] sm:$0xff] }
 0x4dd   :  { %v1539_v62 = vpop.f32.mrf.mxu1 }
 0x4de   :  { %v1558_v63 = vadd.f32 %v1539_v62, %v1346_v54  ;;  %v2094_v54 = vld [vmem:[%s7442_s6] sm:$0xff] }
 0x4df   :  { %5233 = vmatpush3.msra.mxu1 %v2094_v54 }
 0x4e0   :  { %5260 = vmatprep.subr.mxu1 %v5643_v1 }
 0x4e3   :  { %v5158_v22 = vpop.f32.mrf.mxu1 }
 0x4e4   :  { %v1561_v23 = vadd.f32 %v5158_v22, %v1349_v57  ;;  %v4726_v57 = vld [vmem:[%s7442_s6 + $0x30] sm:$0xff] }
 0x4e5   :  { %v1549_v24 = vpop.f32.mrf.mxu1 }
 0x4e6   :  { %v1560_v26 = vadd.f32 %v1549_v24, %v1348_v59  ;;  %v4724_v59 = vld [vmem:[%s7442_s6 + $0x20] sm:$0xff] }
 0x505   :  { %v1649_v49 = vpop.f32.mrf.mxu1 }
 0x506   :  { %5161 = vmatprep.mubr.msk.f32.mxu0 %vm300_vm3, %v1649_v49 }
 0x507   :  { %v1651_v27 = vpop.f32.mrf.mxu1 }
 0x509   :  { %v1654_v29 = vpop.f32.mrf.mxu1 }
 0x50a   :  { %5162 = vmatmul.mubr.msk.f32.vlgmr.msra.gmra.mxu0 %vm300_vm3, %v1654_v29 }
 0x50b   :  { %v1656_v51 = vpop.f32.mrf.mxu1  ;;  %5168 = vmatpush3.msk.msra.mxu0 %vm313_vm2, %v4708_v21  ;;  %v4718_v21 = vld [vmem:[%s7441_s5 + $0x18] sm:$0xff] }
 0x50c   :  { %5175 = vmatprep.subr.mxu0 %v5643_v1 }
 0x50d   :  { %v1659_v53 = vpop.f32.mrf.mxu1 }
 0x50e   :  { %5164 = vmatprep.mubr.msk.f32.mxu0 %vm300_vm3, %v1659_v53  ;;  %v4734_v53 = vld [vmem:[%s7441_s5 + $0x30] sm:$0xff] }
 0x50f   :  { %v1661_v55 = vpop.f32.mrf.mxu1 }
 0x510   :  { %v4735_v55 = vld [vmem:[%s7441_s5 + $0x38] sm:$0xff] }
 0x511   :  { %v1664_v30 = vpop.f32.mrf.mxu1 }
 0x512   :  { %5165 = vmatmul.mubr.msk.f32.gmra.mxu0 %vm300_vm3, %v1664_v30  ;;  %v4736_v30 = vld [vmem:[%s7441_s5 + $0x40] sm:$0x3] }
 0x513   :  { %v1666_v33 = vpop.f32.mrf.mxu1 }
 0x514   :  { %v4747_v33 = vld [vmem:[%s7441_s5 + $0x48] sm:$0xff] }
 0x52f   :  { %v1861_v25 = vpop.f32.mrf.mxu1 }
 0x530   :  { %5169 = vmatprep.mubr.msk.f32.mxu0 %vm300_vm3, %v1861_v25  ;;  %v4748_v25 = vld [vmem:[%s7441_s5 + $0x50] sm:$0xff] }
 0x531   :  { %v1863_v28 = vpop.f32.mrf.mxu1 }
 0x532   :  { %v4749_v28 = vld [vmem:[%s7441_s5 + $0x58] sm:$0x3]  ;;  %s5645_s5 = smov [#allocation2]  }
 0x533   :  { %v1866_v31 = vpop.f32.mrf.mxu1  ;;  %s4544_s0 = sshll.u32 %s5645_s5, 4  ;;  %s4545_s0 = int_to_ptr.vmem [resolvable:$true] %s4544_s0 }
 0x534   :  { %5170 = vmatmul.mubr.msk.f32.vlgmr.msra.gmra.mxu0 %vm300_vm3, %v1866_v31  ;;  %v4743_v31 = vld [vmem:[%s7442_s6 + $0x58] sm:$0xff]  ;;  %p5626_p1 = scmp.lt.s32.totalorder %s4545_s0, %s4545_s0 }
 0x535   :  { %v1868_v32 = vpop.f32.mrf.mxu1 }
 0x536   :  { %v4742_v32 = vld [vmem:[%s7442_s6 + $0x50] sm:$0xff] }
 0x537   :  { %v1871_v34 = vpop.f32.mrf.mxu1 }
 0x538   :  { %5172 = vmatprep.mubr.msk.f32.mxu0 %vm300_vm3, %v1871_v34  ;;  %v4741_v34 = vld [vmem:[%s7442_s6 + $0x48] sm:$0xff] }
 0x539   :  { %v1873_v35 = vpop.f32.mrf.mxu1 }
 0x53a   :  { %v4740_v35 = vld [vmem:[%s7442_s6 + $0x40] sm:$0xff] }
 0x53b   :  { %v1876_v36 = vpop.f32.mrf.mxu1 }
 0x53c   :  { %5173 = vmatmul.mubr.msk.f32.gmra.mxu0 %vm300_vm3, %v1876_v36 }
 0x53d   :  { %v1878_v37 = vpop.f32.mrf.mxu1  ;;  %5183 = vmatprep.mubr.msk.f32.mxu0 %vm5644_vm4, %v5643_v1 }
 0x5ca   :  { %v5163_v41 = vpop.f32.mrf.mxu0 }
 0x5cb   :  { %v1771_v47 = vadd.f32 %v5163_v41, %v1559_v61 }
 0x5cc   :  { %v1751_v42 = vpop.f32.mrf.mxu0 }
 0x5cd   :  { %v1770_v2 = vadd.f32 %v1751_v42, %v1558_v63 }
 0x5d2   :  { %v5166_v43 = vpop.f32.mrf.mxu0 }
 0x5d3   :  { %v1773_v0 = vadd.f32 %v5166_v43, %v1561_v23 }
 0x5d4   :  { %v1761_v44 = vpop.f32.mrf.mxu0 }
 0x5d5   :  { %v1772_v3 = vadd.f32 %v1761_v44, %v1560_v26 }
 0x5f4   :  { %v5171_v45 = vpop.f32.mrf.mxu0 }
 0x5f5   :  { %v1983_v4 = vadd.f32 %v5171_v45, %v1771_v47 }
 0x5f6   :  { %v1963_v46 = vpop.f32.mrf.mxu0 }
 0x5f7   :  { %v1982_v8 = vadd.f32 %v1963_v46, %v1770_v2  ;;  %v1994_v11 = vadd.f32 %v4714_v6, %v1983_v4 }
 0x5f9   :  { %v1993_v14 = vadd.f32 %v4714_v6, %v1982_v8  ;;  %v6718_v16 = vmax.f32 %v1994_v11, 0.0 }
 0x5fb   :  { %v6722_v17 = vmax.f32 %v1993_v14, 0.0 }
 0x5fc   :  { %v5174_v48 = vpop.f32.mrf.mxu0 }
 0x5fd   :  { %v1985_v5 = vadd.f32 %v5174_v48, %v1773_v0 }
 0x5fe   :  { %v1973_v7 = vpop.f32.mrf.mxu0 }
 0x5ff   :  { %v1996_v9 = vadd.f32 %v4714_v6, %v1985_v5  ;;  %v1984_v10 = vadd.f32 %v1973_v7, %v1772_v3  ;;  %v4756_v3 = vld [vmem:[%s7442_s6 + $0x78] sm:$0xff]  ;;  %v4755_v5 = vld [vmem:[%s7442_s6 + $0x70] sm:$0xff]  ;;  %v4754_v7 = vld [vmem:[%s7442_s6 + $0x68] sm:$0xff] }
 0x601   :  { %v6712_v12 = vmax.f32 %v1996_v9, 0.0  ;;  %v1995_v13 = vadd.f32 %v4714_v6, %v1984_v10  ;;  %v4753_v9 = vld [vmem:[%s7442_s6 + $0x60] sm:$0xff] }
 0x603   :  { %v6714_v15 = vmax.f32 %v1995_v13, 0.0  ;;  %5176 = vmatpush3.msra.mxu0 %v6712_v12 }
 0x604   :  { %5177 = vmatprep.subr.mxu0 %v5643_v1 }
 0x605   :  { %5178 = vmatpush3.msra.mxu0 %v6714_v15 }
 0x606   :  { %5179 = vmatprep.subr.mxu0 %v5643_v1 }
 0x607   :  { %5180 = vmatpush3.msra.mxu0 %v6718_v16 }
 0x608   :  { %5181 = vmatprep.subr.mxu0 %v5643_v1 }
 0x609   :  { %5182 = vmatpush3.msra.mxu0 %v6722_v17 }
 0x60a   :  { %5184 = vmatmul.mubr.msk.f32.vlgmr.msra.gmra.mxu0 %vm2004_vm5, %v2001_v18  ;;  %5192 = vmatprep.subr.mxu0 %v5643_v1 }
 0x60b   :  { %5193 = vmatpush3.msra.mxu0 %v6712_v12  ;;  %5186 = vmatprep.mubr.msk.f32.mxu0 %vm5644_vm4, %v5643_v1 }
 0x60c   :  { %5194 = vmatprep.subr.mxu0 %v5643_v1 }
 0x60d   :  { %5195 = vmatpush3.msra.mxu0 %v6714_v15 }
 0x60e   :  { %5187 = vmatmul.mubr.msk.f32.gmra.mxu0 %vm2004_vm5, %v2002_v19  ;;  %5196 = vmatprep.subr.mxu0 %v5643_v1  ;;  %v4773_v19 = vld [vmem:[%s7445_s9 + $0x78] sm:$0xff] }
 0x60f   :  { %5197 = vmatpush3.msra.mxu0 %v6718_v16  ;;  %5189 = vmatprep.mubr.msk.f32.mxu0 %vm5644_vm4, %v5643_v1 }
 0x610   :  { %5198 = vmatprep.subr.mxu0 %v5643_v1 }
 0x611   :  { %5199 = vmatpush3.msra.mxu0 %v6722_v17 }
 0x612   :  { %5190 = vmatmul.mubr.msk.f32.gmra.mxu0 %vm2004_vm5, %v2003_v20  ;;  %5209 = vmatprep.subr.mxu0 %v5643_v1  ;;  %v4772_v20 = vld [vmem:[%s7445_s9 + $0x70] sm:$0xff] }
 0x613   :  { %5200 = vmatprep.mubr.msk.f32.mxu0 %vm5644_vm4, %v5643_v1 }
 0x616   :  { %5201 = vmatmul.mubr.msk.f32.vlgmr.msra.gmra.mxu0 %vm2004_vm5, %v4718_v21  ;;  %v4771_v21 = vld [vmem:[%s7445_s9 + $0x68] sm:$0xff] }
 0x617   :  { %5203 = vmatprep.mubr.msk.f32.mxu0 %vm5644_vm4, %v5643_v1  ;;  %5210 = vmatpush3.msra.mxu0 %v4727_v56 }
 0x618   :  { %5211 = vmatprep.subr.mxu0 %v5643_v1 }
 0x619   :  { %5212 = vmatpush3.msra.mxu0 %v4726_v57 }
 0x61a   :  { %5204 = vmatmul.mubr.msk.f32.gmra.mxu0 %vm2004_vm5, %v4719_v50  ;;  %5213 = vmatprep.subr.mxu0 %v5643_v1  ;;  %v4770_v50 = vld [vmem:[%s7445_s9 + $0x60] sm:$0xff] }
 0x61b   :  { %5206 = vmatprep.mubr.msk.f32.mxu0 %vm5644_vm4, %v5643_v1  ;;  %5214 = vmatpush3.msra.mxu0 %v4725_v58 }
 0x61c   :  { %5215 = vmatprep.subr.mxu0 %v5643_v1 }
 0x61d   :  { %5216 = vmatpush3.msra.mxu0 %v4724_v59 }
 0x61e   :  { %5207 = vmatmul.mubr.msk.f32.gmra.mxu0 %vm2004_vm5, %v4720_v52  ;;  %5243 = vmatprep.subr.mxu0 %v5643_v1  ;;  %v4769_v52 = vld [vmem:[%s7445_s9 + $0x58] sm:$0xff] }
 0x61f   :  { %5217 = vmatprep.mubr.msk.f32.mxu0 %vm5644_vm4, %v5643_v1 }
 0x6ca   :  { %v2080_v60 = vpop.f32.mrf.mxu0 }
 0x6cb   :  { %5235 = vmatmul.mubr.msk.f32.vlgmr.msra.gmra.mxu1 %vm2004_vm5, %v2080_v60 }
 0x6cc   :  { %v5185_v61 = vpop.f32.mrf.mxu0  ;;  %5237 = vmatprep.mubr.msk.f32.mxu1 %vm5644_vm4, %v5643_v1  ;;  %5261 = vmatpush3.msra.mxu1 %v4743_v31 }
 0x6cd   :  { %5262 = vmatprep.subr.mxu1 %v5643_v1 }
 0x6ce   :  { %v2085_v62 = vpop.f32.mrf.mxu0  ;;  %5263 = vmatpush3.msra.mxu1 %v4742_v32 }
 0x6cf   :  { %5238 = vmatmul.mubr.msk.f32.gmra.mxu1 %vm2004_vm5, %v2085_v62  ;;  %5264 = vmatprep.subr.mxu1 %v5643_v1 }
 0x6d0   :  { %v5188_v63 = vpop.f32.mrf.mxu0  ;;  %5240 = vmatprep.mubr.msk.f32.mxu1 %vm5644_vm4, %v5643_v1  ;;  %5265 = vmatpush3.msra.mxu1 %v4741_v34  ;;  %v2767_v34 = vld [vmem:[%s7444_s8] sm:$0x3] }
 0x6d1   :  { %5266 = vmatprep.subr.mxu1 %v5643_v1 }
 0x6d2   :  { %v2090_v22 = vpop.f32.mrf.mxu0  ;;  %5267 = vmatpush3.msra.mxu1 %v4740_v35  ;;  %v4763_v35 = vld [vmem:[%s7444_s8 + $0x2] sm:$0x3] }
 0x6d3   :  { %5241 = vmatmul.mubr.msk.f32.gmra.mxu1 %vm2004_vm5, %v2090_v22  ;;  %5294 = vmatprep.subr.mxu1 %v5643_v1 }
 0x6d4   :  { %v5191_v23 = vpop.f32.mrf.mxu0  ;;  %5268 = vmatprep.mubr.msk.f32.mxu1 %vm5644_vm4, %v5643_v1 }
 0x6d6   :  { %v2177_v24 = vpop.f32.mrf.mxu0 }
 0x6d7   :  { %5218 = vmatmul.mubr.msk.f32.vlgmr.msra.gmra.mxu0 %vm2004_vm5, %v2177_v24 }
 0x6d8   :  { %5244 = vmatpush3.msra.mxu0 %v6712_v12  ;;  %v5202_v26 = vpop.f32.mrf.mxu0  ;;  %5220 = vmatprep.mubr.msk.f32.mxu0 %vm5644_vm4, %v5643_v1 }
 0x6d9   :  { %5245 = vmatprep.subr.mxu0 %v5643_v1 }
 0x6da   :  { %5246 = vmatpush3.msra.mxu0 %v6714_v15  ;;  %v2182_v49 = vpop.f32.mrf.mxu0 }
 0x6db   :  { %5247 = vmatprep.subr.mxu0 %v5643_v1  ;;  %5221 = vmatmul.mubr.msk.f32.gmra.mxu0 %vm2004_vm5, %v2182_v49 }
 0x6dc   :  { %5248 = vmatpush3.msra.mxu0 %v6718_v16  ;;  %v5205_v27 = vpop.f32.mrf.mxu0  ;;  %5223 = vmatprep.mubr.msk.f32.mxu0 %vm5644_vm4, %v5643_v1 }
 0x6dd   :  { %5249 = vmatprep.subr.mxu0 %v5643_v1 }
 0x6de   :  { %5250 = vmatpush3.msra.mxu0 %v6722_v17  ;;  %v2187_v29 = vpop.f32.mrf.mxu0 }
 0x6df   :  { %5224 = vmatmul.mubr.msk.f32.gmra.mxu0 %vm2004_vm5, %v2187_v29  ;;  %5277 = vmatprep.subr.mxu0 %v5643_v1 }
 0x6e0   :  { %v5208_v51 = vpop.f32.mrf.mxu0  ;;  %5251 = vmatprep.mubr.msk.f32.mxu0 %vm5644_vm4, %v5643_v1 }
 0x6e3   :  { %5252 = vmatmul.mubr.msk.f32.vlgmr.msra.gmra.mxu0 %vm2004_vm5, %v4734_v53  ;;  %v4760_v53 = vld [vmem:[%s7443_s7] ss:$0 sm:$0xff] }
 0x6e4   :  { %5278 = vmatpush3.msra.mxu0 %v6712_v12  ;;  %5254 = vmatprep.mubr.msk.f32.mxu0 %vm5644_vm4, %v5643_v1 }
 0x6e5   :  { %5279 = vmatprep.subr.mxu0 %v5643_v1 }
 0x6e6   :  { %5280 = vmatpush3.msra.mxu0 %v6714_v15 }
 0x6e7   :  { %5281 = vmatprep.subr.mxu0 %v5643_v1  ;;  %5255 = vmatmul.mubr.msk.f32.gmra.mxu0 %vm2004_vm5, %v4735_v55 }
 0x6e8   :  { %5282 = vmatpush3.msra.mxu0 %v6718_v16  ;;  %5257 = vmatprep.mubr.msk.f32.mxu0 %vm5644_vm4, %v5643_v1 }
 0x6e9   :  { %5283 = vmatprep.subr.mxu0 %v5643_v1 }
 0x6ea   :  { %5284 = vmatpush3.msra.mxu0 %v6722_v17 }
 0x6eb   :  { %5258 = vmatmul.mubr.msk.f32.gmra.mxu0 %vm2004_vm5, %v4736_v30  ;;  %5311 = vmatprep.subr.mxu0 %v5643_v1 }
 0x6ec   :  { %5285 = vmatprep.mubr.msk.f32.mxu0 %vm5644_vm4, %v5643_v1 }
 0x6ef   :  { %5286 = vmatmul.mubr.msk.f32.vlgmr.msra.gmra.mxu0 %vm2004_vm5, %v4747_v33 }
 0x6f0   :  { %5288 = vmatprep.mubr.msk.f32.mxu0 %vm5644_vm4, %v5643_v1 }
 0x6f3   :  { %5289 = vmatmul.mubr.msk.f32.gmra.mxu0 %vm2004_vm5, %v4748_v25 }
 0x6f4   :  { %5291 = vmatprep.mubr.msk.f32.mxu0 %vm5644_vm4, %v5643_v1 }
 0x6f7   :  { %5292 = vmatmul.mubr.msk.f32.gmra.mxu0 %vm2004_vm5, %v4749_v28 }
 0x6f8   :  { %5317 = vmatprep.mubr.msk.f32.mxu0 %vm5644_vm4, %v5643_v1 }
 0x78b   :  { %v2360_v36 = vpop.f32.mrf.mxu1 }
 0x78d   :  { %v5236_v37 = vpop.f32.mrf.mxu1 }
 0x78e   :  { %v2851_v37 = vld [vmem:[%s7445_s9 + $0x30] sm:$0xff] }
 0x78f   :  { %v2365_v38 = vpop.f32.mrf.mxu1 }
 0x791   :  { %v5239_v39 = vpop.f32.mrf.mxu1 }
 0x792   :  { %v2849_v39 = vld [vmem:[%s7445_s9 + $0x20] sm:$0xff] }
 0x793   :  { %v2370_v40 = vpop.f32.mrf.mxu1 }
 0x795   :  { %v5242_v41 = vpop.f32.mrf.mxu1 }
 0x796   :  { %v2847_v41 = vld [vmem:[%s7445_s9 + $0x10] sm:$0xff] }
 0x797   :  { %v2271_v42 = vpop.f32.mrf.mxu0 }
 0x798   :  { %v6878_v43 = vadd.f32 %v2360_v36, %v2271_v42  ;;  %v2852_v36 = vld [vmem:[%s7445_s9 + $0x38] sm:$0xff]  ;;  %v2846_v42 = vld [vmem:[%s7445_s9 + $0x8] sm:$0xff] }
 0x799   :  { %v5219_v44 = vpop.f32.mrf.mxu0 }
 0x79a   :  { %v4768_v44 = vld [vmem:[%s7445_s9 + $0x50] sm:$0xff] }
 0x79b   :  { %v2276_v45 = vpop.f32.mrf.mxu0 }
 0x79c   :  { %v6880_v46 = vadd.f32 %v2365_v38, %v2276_v45  ;;  %v2850_v38 = vld [vmem:[%s7445_s9 + $0x28] sm:$0xff] }
 0x79d   :  { %v5222_v47 = vpop.f32.mrf.mxu0  ;;  %v4767_v45 = vld [vmem:[%s7445_s9 + $0x48] sm:$0xff] }
 0x79f   :  { %v2281_v0 = vpop.f32.mrf.mxu0 }
 0x7a0   :  { %v6882_v48 = vadd.f32 %v2370_v40, %v2281_v0  ;;  %v2848_v40 = vld [vmem:[%s7445_s9 + $0x18] sm:$0xff] }
 0x7a1   :  { %v5225_v2 = vpop.f32.mrf.mxu0 }
 0x7a3   :  { %v2453_v4 = vpop.f32.mrf.mxu0 }
 0x7a4   :  { %5269 = vmatmul.mubr.msk.f32.vlgmr.msra.gmra.mxu1 %vm2004_vm5, %v2453_v4 }
 0x7a5   :  { %v5253_v6 = vpop.f32.mrf.mxu0  ;;  %5271 = vmatprep.mubr.msk.f32.mxu1 %vm5644_vm4, %v5643_v1  ;;  %5295 = vmatpush3.msra.mxu1 %v4756_v3  ;;  %v4798_v3 = vld [vmem:[%s7445_s9 + $0xf8] sm:$0xff] }
 0x7a6   :  { %5296 = vmatprep.subr.mxu1 %v5643_v1  ;;  %v4776_v6 = vld [vmem:[%s7444_s8 + $0x4] sm:$0x3] }
 0x7a7   :  { %v2458_v8 = vpop.f32.mrf.mxu0  ;;  %5297 = vmatpush3.msra.mxu1 %v4755_v5  ;;  %v4797_v5 = vld [vmem:[%s7445_s9 + $0xf0] sm:$0xff] }
 0x7a8   :  { %5272 = vmatmul.mubr.msk.f32.gmra.mxu1 %vm2004_vm5, %v2458_v8  ;;  %5298 = vmatprep.subr.mxu1 %v5643_v1  ;;  %v4786_v8 = vld [vmem:[%s7445_s9 + $0xb8] sm:$0xff] }
 0x7a9   :  { %v5256_v10 = vpop.f32.mrf.mxu0  ;;  %5274 = vmatprep.mubr.msk.f32.mxu1 %vm5644_vm4, %v5643_v1  ;;  %5299 = vmatpush3.msra.mxu1 %v4754_v7  ;;  %v4796_v7 = vld [vmem:[%s7445_s9 + $0xe8] sm:$0xff] }
 0x7aa   :  { %5300 = vmatprep.subr.mxu1 %v5643_v1  ;;  %v4785_v10 = vld [vmem:[%s7445_s9 + $0xb0] sm:$0xff] }
 0x7ab   :  { %v2463_v11 = vpop.f32.mrf.mxu0  ;;  %5301 = vmatpush3.msra.mxu1 %v4753_v9  ;;  %v4795_v9 = vld [vmem:[%s7445_s9 + $0xe0] sm:$0xff] }
 0x7ac   :  { %5275 = vmatmul.mubr.msk.f32.gmra.mxu1 %vm2004_vm5, %v2463_v11  ;;  %5329 = vmatprep.subr.mxu1 %v5643_v1  ;;  %v4794_v11 = vld [vmem:[%s7445_s9 + $0xd8] sm:$0xff] }
 0x7ad   :  { %v5259_v12 = vpop.f32.mrf.mxu0  ;;  %5302 = vmatprep.mubr.msk.f32.mxu1 %vm5644_vm4, %v5643_v1 }
 0x7ae   :  { %v4784_v12 = vld [vmem:[%s7445_s9 + $0xa8] sm:$0xff] }
 0x7af   :  { %v2643_v13 = vpop.f32.mrf.mxu0 }
 0x7b0   :  { %5303 = vmatmul.mubr.msk.f32.vlgmr.msra.gmra.mxu1 %vm2004_vm5, %v2643_v13  ;;  %v4793_v13 = vld [vmem:[%s7445_s9 + $0xd0] sm:$0xff] }
 0x7b1   :  { %v5287_v14 = vpop.f32.mrf.mxu0  ;;  %5305 = vmatprep.mubr.msk.f32.mxu1 %vm5644_vm4, %v5643_v1  ;;  %5330 = vmatpush3.msra.mxu1 %v4773_v19  ;;  %v4780_v19 = vld [vmem:[%s7445_s9 + $0x88] sm:$0xff] }
 0x7b2   :  { %5331 = vmatprep.subr.mxu1 %v5643_v1  ;;  %v4783_v14 = vld [vmem:[%s7445_s9 + $0xa0] sm:$0xff] }
 0x7b3   :  { %v2648_v15 = vpop.f32.mrf.mxu0  ;;  %5332 = vmatpush3.msra.mxu1 %v4772_v20  ;;  %v4779_v20 = vld [vmem:[%s7445_s9 + $0x80] sm:$0xff] }
 0x7b4   :  { %5306 = vmatmul.mubr.msk.f32.gmra.mxu1 %vm2004_vm5, %v2648_v15  ;;  %5333 = vmatprep.subr.mxu1 %v5643_v1  ;;  %v4792_v15 = vld [vmem:[%s7445_s9 + $0xc8] sm:$0xff] }
 0x7b5   :  { %v5290_v16 = vpop.f32.mrf.mxu0  ;;  %5308 = vmatprep.mubr.msk.f32.mxu1 %vm5644_vm4, %v5643_v1  ;;  %5334 = vmatpush3.msra.mxu1 %v4771_v21 }
 0x7b6   :  { %5335 = vmatprep.subr.mxu1 %v5643_v1  ;;  %v4782_v16 = vld [vmem:[%s7445_s9 + $0x98] sm:$0xff] }
 0x7b7   :  { %v2653_v17 = vpop.f32.mrf.mxu0  ;;  %5336 = vmatpush3.msra.mxu1 %v4770_v50 }
 0x7b8   :  { %5309 = vmatmul.mubr.msk.f32.gmra.mxu1 %vm2004_vm5, %v2653_v17  ;;  %5337 = vmatprep.subr.mxu1 %v5643_v1  ;;  %v4791_v17 = vld [vmem:[%s7445_s9 + $0xc0] sm:$0xff] }
 0x7b9   :  { %v5293_v18 = vpop.f32.mrf.mxu0  ;;  %5345 = vmatprep.mubr.msk.f32.mxu1 %vm5644_vm4, %v5643_v1  ;;  %5338 = vmatpush3.msra.mxu1 %v4769_v52 }
 0x7ba   :  { %5339 = vmatprep.subr.mxu1 %v5643_v1  ;;  %v4781_v18 = vld [vmem:[%s7445_s9 + $0x90] sm:$0xff] }
 0x7bb   :  { %5340 = vmatpush3.msra.mxu1 %v4768_v44  ;;  %v4836_v44 = vld [vmem:[%s7444_s8 + $0xe] sm:$0x3] }
 0x7bc   :  { %5341 = vmatprep.subr.mxu1 %v5643_v1 }
 0x7bd   :  { %5342 = vmatpush3.msra.mxu1 %v4767_v45 }
 0x7be   :  { %5343 = vmatprep.subr.mxu1 %v5643_v1 }
 0x864   :  { %v2547_v54 = vpop.f32.mrf.mxu1 }
 0x865   :  { %v2561_v24 = vadd.f32 %v2547_v54, %v6878_v43  ;;  %v2845_v43 = vld [vmem:[%s7445_s9] sm:$0xff] }
 0x866   :  { %v5270_v56 = vpop.f32.mrf.mxu1 }
 0x868   :  { %v2552_v57 = vpop.f32.mrf.mxu1 }
 0x869   :  { %v2562_v22 = vadd.f32 %v2552_v57, %v6880_v46  ;;  %v4766_v46 = vld [vmem:[%s7445_s9 + $0x40] sm:$0xff] }
 0x86a   :  { %v5273_v58 = vpop.f32.mrf.mxu1  ;;  %5344 = vmatpush3.msra.mxu1 %v4766_v46  ;;  %v4846_v46 = vld [vmem:[%s7445_s9 + $0x1f8] sm:$0xff] }
 0x86b   :  { %5367 = vmatprep.subr.mxu1 %v5643_v1 }
 0x86c   :  { %v2557_v59 = vpop.f32.mrf.mxu1 }
 0x86d   :  { %v2563_v26 = vadd.f32 %v2557_v59, %v6882_v48  ;;  %v4788_v48 = vld [vmem:[%s7444_s8 + $0x6] sm:$0x3]  ;;  %v4812_v59 = vld [vmem:[%s7444_s8 + $0xa] sm:$0x3] }
 0x86e   :  { %v5276_v60 = vpop.f32.mrf.mxu1 }
 0x870   :  { %v2737_v61 = vpop.f32.mrf.mxu1 }
 0x871   :  { %v2751_v29 = vadd.f32 %v2737_v61, %v2561_v24  ;;  %v4822_v61 = vld [vmem:[%s7445_s9 + $0x178] sm:$0xff] }
 0x872   :  { %v5304_v62 = vpop.f32.mrf.mxu1  ;;  %v4810_v24 = vld [vmem:[%s7445_s9 + $0x138] sm:$0xff] }
 0x873   :  { %v2761_v25 = vadd.f32 %v4760_v53, %v2751_v29  ;;  %v4808_v29 = vld [vmem:[%s7445_s9 + $0x128] sm:$0xff] }
 0x874   :  { %v2742_v63 = vpop.f32.mrf.mxu1 }
 0x875   :  { %v2752_v49 = vadd.f32 %v2742_v63, %v2562_v22  ;;  %v6951_v32 = vmax.f32 %v2761_v25, 0.0  ;;  %v4821_v63 = vld [vmem:[%s7445_s9 + $0x170] sm:$0xff]  ;;  %v4800_v22 = vld [vmem:[%s7444_s8 + $0x8] sm:$0x3] }
 0x876   :  { %v5307_v23 = vpop.f32.mrf.mxu1  ;;  %v4805_v25 = vld [vmem:[%s7445_s9 + $0x110] sm:$0xff] }
 0x877   :  { %v2762_v30 = vadd.f32 %v4760_v53, %v2752_v49  ;;  %v4820_v23 = vld [vmem:[%s7445_s9 + $0x168] sm:$0xff]  ;;  %v4809_v49 = vld [vmem:[%s7445_s9 + $0x130] sm:$0xff] }
 0x878   :  { %v2747_v27 = vpop.f32.mrf.mxu1 }
 0x879   :  { %v2753_v51 = vadd.f32 %v2747_v27, %v2563_v26  ;;  %v6946_v31 = vmax.f32 %v2762_v30, 0.0  ;;  %v4819_v26 = vld [vmem:[%s7445_s9 + $0x160] sm:$0xff]  ;;  %v4818_v27 = vld [vmem:[%s7445_s9 + $0x158] sm:$0xff] }
 0x87a   :  { %v5310_v55 = vpop.f32.mrf.mxu1  ;;  %v4806_v30 = vld [vmem:[%s7445_s9 + $0x118] sm:$0xff] }
 0x87b   :  { %v2763_v33 = vadd.f32 %v4760_v53, %v2753_v51  ;;  %v4817_v51 = vld [vmem:[%s7445_s9 + $0x150] sm:$0xff]  ;;  %v4807_v53 = vld [vmem:[%s7445_s9 + $0x120] sm:$0xff]  ;;  %v4816_v55 = vld [vmem:[%s7445_s9 + $0x148] sm:$0xff] }
 0x87d   :  { %v6944_v28 = vmax.f32 %v2763_v33, 0.0  ;;  %v4815_v33 = vld [vmem:[%s7445_s9 + $0x140] sm:$0xff] }
 0x87f   :  { %5312 = vmatpush3.msk.msra.mxu0 %vm102_vm0, %v6944_v28 }
 0x880   :  { %5313 = vmatprep.subr.mxu0 %v5643_v1 }
 0x881   :  { %5314 = vmatpush3.msra.mxu0 %v6946_v31 }
 0x882   :  { %5315 = vmatprep.subr.mxu0 %v5643_v1 }
 0x883   :  { %5316 = vmatpush3.msra.mxu0 %v6951_v32 }
 0x884   :  { %5318 = vmatmul.mubr.msk.f32.vlgmr.msra.gmra.mxu0 %vm2768_vm6, %v2767_v34  ;;  %5320 = vmatprep.subr.mxu0 %v5643_v1  ;;  %v4804_v34 = vld [vmem:[%s7445_s9 + $0x108] sm:$0xff] }
 0x885   :  { %5321 = vmatpush3.msk.msra.mxu0 %vm102_vm0, %v6944_v28  ;;  %5326 = vmatprep.mubr.msk.f32.mxu0 %vm5644_vm4, %v5643_v1 }
 0x886   :  { %5322 = vmatprep.subr.mxu0 %v5643_v1 }
 0x887   :  { %5323 = vmatpush3.msra.mxu0 %v6946_v31 }
 0x888   :  { %5324 = vmatprep.subr.mxu0 %v5643_v1 }
 0x889   :  { %5325 = vmatpush3.msra.mxu0 %v6951_v32 }
 0x88a   :  { %5327 = vmatmul.mubr.msk.f32.vlgmr.msra.gmra.mxu0 %vm2768_vm6, %v4763_v35  ;;  %5348 = vmatprep.subr.mxu0 %v5643_v1  ;;  %v4803_v35 = vld [vmem:[%s7445_s9 + $0x100] sm:$0xff] }
 0x88b   :  { %5349 = vmatpush3.msra.mxu0 %v2852_v36  ;;  %5364 = vmatprep.mubr.msk.f32.mxu0 %vm5644_vm4, %v5643_v1 }
 0x88c   :  { %5350 = vmatprep.subr.mxu0 %v5643_v1 }
 0x88d   :  { %5351 = vmatpush3.msra.mxu0 %v2851_v37 }
 0x88e   :  { %5352 = vmatprep.subr.mxu0 %v5643_v1 }
 0x88f   :  { %5353 = vmatpush3.msra.mxu0 %v2850_v38 }
 0x890   :  { %5354 = vmatprep.subr.mxu0 %v5643_v1 }
 0x891   :  { %5355 = vmatpush3.msra.mxu0 %v2849_v39 }
 0x892   :  { %5356 = vmatprep.subr.mxu0 %v5643_v1 }
 0x893   :  { %5357 = vmatpush3.msra.mxu0 %v2848_v40 }
 0x894   :  { %5358 = vmatprep.subr.mxu0 %v5643_v1 }
 0x895   :  { %5359 = vmatpush3.msra.mxu0 %v2847_v41 }
 0x896   :  { %5360 = vmatprep.subr.mxu0 %v5643_v1 }
 0x897   :  { %5361 = vmatpush3.msra.mxu0 %v2846_v42 }
 0x898   :  { %5362 = vmatprep.subr.mxu0 %v5643_v1 }
 0x899   :  { %5363 = vmatpush3.msra.mxu0 %v2845_v43 }
 0x89a   :  { %5395 = vmatprep.subr.mxu0 %v5643_v1 }
 0x944   :  { %v2841_v47 = vpop.f32.mrf.mxu0 }
 0x945   :  { %5365 = vmatmul.mubr.msk.f32.vlgmr.msra.gmra.mxu0 %vm2937_vm7, %v2841_v47 }
 0x946   :  { %5396 = vmatpush3.msk.msra.mxu0 %vm102_vm0, %v6944_v28  ;;  %v5319_v0 = vpop.f32.mrf.mxu0  ;;  %5401 = vmatprep.mubr.msk.f32.mxu0 %vm5644_vm4, %v5643_v1 }
 0x947   :  { %5397 = vmatprep.subr.mxu0 %v5643_v1  ;;  %v4845_v0 = vld [vmem:[%s7445_s9 + $0x1f0] sm:$0xff] }
 0x948   :  { %5398 = vmatpush3.msra.mxu0 %v6946_v31 }
 0x949   :  { %5399 = vmatprep.subr.mxu0 %v5643_v1 }
 0x94a   :  { %5400 = vmatpush3.msra.mxu0 %v6951_v32  ;;  %v2924_v2 = vpop.f32.mrf.mxu0 }
 0x94b   :  { %5402 = vmatmul.mubr.msk.f32.vlgmr.msra.gmra.mxu0 %vm2768_vm6, %v4788_v48  ;;  %5346 = vmatmul.mubr.msk.f32.vlgmr.msra.gmra.mxu1 %vm2937_vm7, %v2924_v2  ;;  %v4824_v48 = vld [vmem:[%s7444_s8 + $0xc] sm:$0x3]  ;;  %v4834_v2 = vld [vmem:[%s7445_s9 + $0x1b8] sm:$0xff] }
 0x94c   :  { %5368 = vmatpush3.msk.msra.mxu1 %vm102_vm0, %v6944_v28  ;;  %5373 = vmatprep.mubr.msk.f32.mxu1 %vm5644_vm4, %v5643_v1  ;;  %v5328_v4 = vpop.f32.mrf.mxu0 }
 0x94d   :  { %5369 = vmatprep.subr.mxu1 %v5643_v1  ;;  %5404 = vmatprep.subr.mxu0 %v5643_v1  ;;  %v4833_v4 = vld [vmem:[%s7445_s9 + $0x1b0] sm:$0xff] }
 0x94e   :  { %5370 = vmatpush3.msra.mxu1 %v6946_v31  ;;  %5405 = vmatpush3.msra.mxu0 %v4798_v3  ;;  %v4844_v3 = vld [vmem:[%s7445_s9 + $0x1e8] sm:$0xff] }
 0x94f   :  { %5371 = vmatprep.subr.mxu1 %v5643_v1  ;;  %5406 = vmatprep.subr.mxu0 %v5643_v1 }
 0x950   :  { %5372 = vmatpush3.msra.mxu1 %v6951_v32  ;;  %5407 = vmatpush3.msra.mxu0 %v4797_v5  ;;  %v4843_v5 = vld [vmem:[%s7445_s9 + $0x1e0] sm:$0xff] }
 0x951   :  { %5374 = vmatmul.mubr.msk.f32.vlgmr.msra.gmra.mxu1 %vm2768_vm6, %v4776_v6  ;;  %5408 = vmatprep.subr.mxu0 %v5643_v1  ;;  %v4832_v6 = vld [vmem:[%s7445_s9 + $0x1a8] sm:$0xff] }
 0x952   :  { %5409 = vmatpush3.msra.mxu0 %v4796_v7  ;;  %5376 = vmatprep.subr.mxu1 %v5643_v1  ;;  %v4831_v7 = vld [vmem:[%s7445_s9 + $0x1a0] sm:$0xff] }
 0x953   :  { %5410 = vmatprep.subr.mxu0 %v5643_v1  ;;  %5377 = vmatpush3.msra.mxu1 %v4786_v8  ;;  %v4830_v8 = vld [vmem:[%s7445_s9 + $0x198] sm:$0xff] }
 0x954   :  { %5411 = vmatpush3.msra.mxu0 %v4795_v9  ;;  %5378 = vmatprep.subr.mxu1 %v5643_v1  ;;  %v4829_v9 = vld [vmem:[%s7445_s9 + $0x190] sm:$0xff] }
 0x955   :  { %5412 = vmatprep.subr.mxu0 %v5643_v1  ;;  %5379 = vmatpush3.msra.mxu1 %v4785_v10  ;;  %v4842_v10 = vld [vmem:[%s7445_s9 + $0x1d8] sm:$0xff] }
 0x956   :  { %5413 = vmatpush3.msra.mxu0 %v4794_v11  ;;  %5380 = vmatprep.subr.mxu1 %v5643_v1  ;;  %v4828_v11 = vld [vmem:[%s7445_s9 + $0x188] sm:$0xff] }
 0x957   :  { %5414 = vmatprep.subr.mxu0 %v5643_v1  ;;  %5381 = vmatpush3.msra.mxu1 %v4784_v12  ;;  %v4841_v12 = vld [vmem:[%s7445_s9 + $0x1d0] sm:$0xff] }
 0x958   :  { %5415 = vmatpush3.msra.mxu0 %v4793_v13  ;;  %5382 = vmatprep.subr.mxu1 %v5643_v1  ;;  %v4827_v13 = vld [vmem:[%s7445_s9 + $0x180] sm:$0xff] }
 0x959   :  { %5416 = vmatprep.subr.mxu0 %v5643_v1  ;;  %5420 = vmatprep.mubr.msk.f32.mxu0 %vm5644_vm4, %v5643_v1 }
 0x95a   :  { %5392 = vmatprep.mubr.msk.f32.mxu1 %vm5644_vm4, %v5643_v1  ;;  %5383 = vmatpush3.msra.mxu1 %v4783_v14  ;;  %v4840_v14 = vld [vmem:[%s7445_s9 + $0x1c8] sm:$0xff] }
 0x95b   :  { %5417 = vmatpush3.msra.mxu0 %v4792_v15  ;;  %5384 = vmatprep.subr.mxu1 %v5643_v1  ;;  %v4839_v15 = vld [vmem:[%s7445_s9 + $0x1c0] sm:$0xff] }
 0x95c   :  { %5418 = vmatprep.subr.mxu0 %v5643_v1  ;;  %5385 = vmatpush3.msra.mxu1 %v4782_v16 }
 0x95d   :  { %5419 = vmatpush3.msra.mxu0 %v4791_v17  ;;  %5386 = vmatprep.subr.mxu1 %v5643_v1 }
 0x95e   :  { %5451 = vmatprep.subr.mxu0 %v5643_v1  ;;  %5387 = vmatpush3.msra.mxu1 %v4781_v18 }
 0x95f   :  { %5388 = vmatprep.subr.mxu1 %v5643_v1 }
 0x960   :  { %5389 = vmatpush3.msra.mxu1 %v4780_v19 }
 0x961   :  { %5390 = vmatprep.subr.mxu1 %v5643_v1 }
 0x962   :  { %5391 = vmatpush3.msra.mxu1 %v4779_v20 }
 0x963   :  { %5423 = vmatprep.subr.mxu1 %v5643_v1 }
 0xa05   :  { %v3080_v21 = vpop.f32.mrf.mxu0 }
 0xa07   :  { %v5366_v50 = vpop.f32.mrf.mxu0 }
 0xa0b   :  { %v3313_v52 = vpop.f32.mrf.mxu0  ;;  %v3007_v54 = vpop.f32.mrf.mxu1 }
 0xa0c   :  { %5421 = vmatmul.mubr.msk.f32.vlgmr.msra.gmra.mxu0 %vm2937_vm7, %v3313_v52  ;;  %v7117_v56 = vadd.f32 %v3080_v21, %v3007_v54 }
 0xa0d   :  { %5452 = vmatpush3.msk.msra.mxu0 %vm102_vm0, %v6944_v28  ;;  %v5347_v57 = vpop.f32.mrf.mxu1  ;;  %5457 = vmatprep.mubr.msk.f32.mxu0 %vm5644_vm4, %v5643_v1  ;;  %v5403_v58 = vpop.f32.mrf.mxu0 }
 0xa0e   :  { %5453 = vmatprep.subr.mxu0 %v5643_v1  ;;  %v4848_v57 = vld [vmem:[%s7444_s8 + $0x10] sm:$0x3]  ;;  %v4858_v58 = vld [vmem:[%s7445_s9 + $0x238] sm:$0xff] }
 0xa0f   :  { %5454 = vmatpush3.msra.mxu0 %v6946_v31 }
 0xa10   :  { %5455 = vmatprep.subr.mxu0 %v5643_v1 }
 0xa11   :  { %5456 = vmatpush3.msra.mxu0 %v6951_v32  ;;  %v3155_v60 = vpop.f32.mrf.mxu1 }
 0xa12   :  { %5458 = vmatmul.mubr.msk.f32.vlgmr.msra.gmra.mxu0 %vm2768_vm6, %v4812_v59  ;;  %5393 = vmatmul.mubr.msk.f32.vlgmr.msra.gmra.mxu1 %vm2937_vm7, %v3155_v60  ;;  %v4854_v59 = vld [vmem:[%s7445_s9 + $0x218] sm:$0xff]  ;;  %v4853_v60 = vld [vmem:[%s7445_s9 + $0x210] sm:$0xff] }
 0xa13   :  { %5424 = vmatpush3.msk.msra.mxu1 %vm102_vm0, %v6944_v28  ;;  %5429 = vmatprep.mubr.msk.f32.mxu1 %vm5644_vm4, %v5643_v1  ;;  %v5375_v62 = vpop.f32.mrf.mxu1 }
 0xa14   :  { %5425 = vmatprep.subr.mxu1 %v5643_v1  ;;  %5460 = vmatprep.subr.mxu0 %v5643_v1  ;;  %v4851_v62 = vld [vmem:[%s7445_s9 + $0x200] sm:$0xff] }
 0xa15   :  { %5426 = vmatpush3.msra.mxu1 %v6946_v31  ;;  %5461 = vmatpush3.msra.mxu0 %v4822_v61  ;;  %v4852_v61 = vld [vmem:[%s7445_s9 + $0x208] sm:$0xff] }
 0xa16   :  { %5427 = vmatprep.subr.mxu1 %v5643_v1  ;;  %5462 = vmatprep.subr.mxu0 %v5643_v1 }
 0xa17   :  { %5428 = vmatpush3.msra.mxu1 %v6951_v32  ;;  %5463 = vmatpush3.msra.mxu0 %v4821_v63  ;;  %v4204_v63 = vld [vmem:[%s7448_s12] sm:$0xf] }
 0xa18   :  { %5430 = vmatmul.mubr.msk.f32.vlgmr.msra.gmra.mxu1 %vm2768_vm6, %v4800_v22  ;;  %5464 = vmatprep.subr.mxu0 %v5643_v1 }
 0xa19   :  { %5465 = vmatpush3.msra.mxu0 %v4820_v23  ;;  %5432 = vmatprep.subr.mxu1 %v5643_v1 }
 0xa1a   :  { %5466 = vmatprep.subr.mxu0 %v5643_v1  ;;  %5433 = vmatpush3.msra.mxu1 %v4810_v24 }
 0xa1b   :  { %5467 = vmatpush3.msra.mxu0 %v4819_v26  ;;  %5434 = vmatprep.subr.mxu1 %v5643_v1 }
 0xa1c   :  { %5468 = vmatprep.subr.mxu0 %v5643_v1  ;;  %5435 = vmatpush3.msra.mxu1 %v4809_v49 }
 0xa1d   :  { %5469 = vmatpush3.msra.mxu0 %v4818_v27  ;;  %5436 = vmatprep.subr.mxu1 %v5643_v1 }
 0xa1e   :  { %5470 = vmatprep.subr.mxu0 %v5643_v1  ;;  %5437 = vmatpush3.msra.mxu1 %v4808_v29 }
 0xa1f   :  { %5471 = vmatpush3.msra.mxu0 %v4817_v51  ;;  %5438 = vmatprep.subr.mxu1 %v5643_v1 }
 0xa20   :  { %5472 = vmatprep.subr.mxu0 %v5643_v1  ;;  %5476 = vmatprep.mubr.msk.f32.mxu0 %vm5644_vm4, %v5643_v1 }
 0xa21   :  { %5448 = vmatprep.mubr.msk.f32.mxu1 %vm5644_vm4, %v5643_v1  ;;  %5439 = vmatpush3.msra.mxu1 %v4807_v53  ;;  %v4203_v53 = vld [vmem:[%s7462_s27] sm:$0x3] }
 0xa22   :  { %5473 = vmatpush3.msra.mxu0 %v4816_v55  ;;  %5440 = vmatprep.subr.mxu1 %v5643_v1  ;;  %v4202_v55 = vld [vmem:[%s7447_s11 + $0x18] sm:$0xff] }
 0xa23   :  { %5474 = vmatprep.subr.mxu0 %v5643_v1  ;;  %5441 = vmatpush3.msra.mxu1 %v4806_v30  ;;  %v4201_v30 = vld [vmem:[%s7447_s11 + $0x10] sm:$0xff] }
 0xa24   :  { %5475 = vmatpush3.msra.mxu0 %v4815_v33  ;;  %5442 = vmatprep.subr.mxu1 %v5643_v1  ;;  %v4200_v33 = vld [vmem:[%s7447_s11 + $0x8] sm:$0xff] }
 0xa25   :  { %5507 = vmatprep.subr.mxu0 %v5643_v1  ;;  %5443 = vmatpush3.msra.mxu1 %v4805_v25  ;;  %v4199_v25 = vld [vmem:[%s7447_s11] sm:$0xff] }
 0xa26   :  { %5444 = vmatprep.subr.mxu1 %v5643_v1 }
 0xa27   :  { %5445 = vmatpush3.msra.mxu1 %v4804_v34 }
 0xa28   :  { %5446 = vmatprep.subr.mxu1 %v5643_v1 }
 0xa29   :  { %5447 = vmatpush3.msra.mxu1 %v4803_v35  ;;  %v4860_v35 = vld [vmem:[%s7446_s10] ss:$0 sm:$0xff] }
 0xa2a   :  { %5479 = vmatprep.subr.mxu1 %v5643_v1 }
 0xacc   :  { %v3395_v36 = vpop.f32.mrf.mxu0 }
 0xace   :  { %v5422_v37 = vpop.f32.mrf.mxu0 }
 0xad2   :  { %v3629_v38 = vpop.f32.mrf.mxu0  ;;  %v3237_v39 = vpop.f32.mrf.mxu1 }
 0xad3   :  { %v3241_v40 = vadd.f32 %v3237_v39, %v7117_v56  ;;  %5477 = vmatmul.mubr.msk.f32.vlgmr.msra.gmra.mxu0 %vm2937_vm7, %v3629_v38 }
 0xad4   :  { %5508 = vmatpush3.msk.msra.mxu0 %vm102_vm0, %v6944_v28  ;;  %v5394_v41 = vpop.f32.mrf.mxu1  ;;  %5513 = vmatprep.mubr.msk.f32.mxu0 %vm5644_vm4, %v5643_v1  ;;  %v5459_v42 = vpop.f32.mrf.mxu0 }
 0xad5   :  { %5509 = vmatprep.subr.mxu0 %v5643_v1  ;;  %v7221_v43 = vadd.f32 %v3395_v36, %v3241_v40  ;;  %v4368_v42 = vld [vmem:[%s7450_s14 + $0x18] sm:$0xff] }
 0xad6   :  { %5510 = vmatpush3.msra.mxu0 %v6946_v31 }
 0xad7   :  { %5511 = vmatprep.subr.mxu0 %v5643_v1 }
 0xad8   :  { %5512 = vmatpush3.msra.mxu0 %v6951_v32  ;;  %v3471_v45 = vpop.f32.mrf.mxu1 }
 0xad9   :  { %5449 = vmatmul.mubr.msk.f32.vlgmr.msra.gmra.mxu1 %vm2937_vm7, %v3471_v45  ;;  %5514 = vmatmul.mubr.msk.f32.vlgmr.msra.gmra.mxu0 %vm2768_vm6, %v4836_v44  ;;  %v4366_v44 = vld [vmem:[%s7450_s14 + $0x8] sm:$0xff]  ;;  %v4365_v45 = vld [vmem:[%s7450_s14] sm:$0xff] }
 0xada   :  { %5480 = vmatpush3.msk.msra.mxu1 %vm102_vm0, %v6944_v28  ;;  %5485 = vmatprep.mubr.msk.f32.mxu1 %vm5644_vm4, %v5643_v1  ;;  %v5431_v47 = vpop.f32.mrf.mxu1 }
 0xadb   :  { %5481 = vmatprep.subr.mxu1 %v5643_v1  ;;  %5516 = vmatprep.subr.mxu0 %v5643_v1  ;;  %v4864_v47 = vld [vmem:[%s7449_s13] ss:$0 sm:$0xff] }
 0xadc   :  { %5482 = vmatpush3.msra.mxu1 %v6946_v31  ;;  %5517 = vmatpush3.msra.mxu0 %v4846_v46 }
 0xadd   :  { %5483 = vmatprep.subr.mxu1 %v5643_v1  ;;  %5518 = vmatprep.subr.mxu0 %v5643_v1 }
 0xade   :  { %5484 = vmatpush3.msra.mxu1 %v6951_v32  ;;  %5519 = vmatpush3.msra.mxu0 %v4845_v0 }
 0xadf   :  { %5486 = vmatmul.mubr.msk.f32.vlgmr.msra.gmra.mxu1 %vm2768_vm6, %v4824_v48  ;;  %5488 = vmatprep.subr.mxu1 %v5643_v1 }
 0xae0   :  { %5489 = vmatpush3.msra.mxu1 %v4834_v2  ;;  %5520 = vmatprep.subr.mxu0 %v5643_v1 }
 0xae1   :  { %5490 = vmatprep.subr.mxu1 %v5643_v1  ;;  %5521 = vmatpush3.msra.mxu0 %v4844_v3 }
 0xae2   :  { %5491 = vmatpush3.msra.mxu1 %v4833_v4  ;;  %5522 = vmatprep.subr.mxu0 %v5643_v1  ;;  %v4451_v4 = vld [vmem:[%s7452_s16 + $0x8] sm:$0xf] }
 0xae3   :  { %5492 = vmatprep.subr.mxu1 %v5643_v1  ;;  %5523 = vmatpush3.msra.mxu0 %v4843_v5  ;;  %v4450_v5 = vld [vmem:[%s7452_s16] sm:$0xff]  ;;  %s5621_s16 = scalar_lea.vmem %s4545_s0, 32 }
 0xae4   :  { %5493 = vmatpush3.msra.mxu1 %v4832_v6  ;;  %5524 = vmatprep.subr.mxu0 %v5643_v1  ;;  %v4865_v6 = vld [vmem:[%s7451_s15] ss:$0 sm:$0xff]  ;;  %p5622_p0 = scmp.ne.s32.totalorder %s4545_s0, %s5621_s16  ;;  %p5627_p2 = scmp.lt.s32.totalorder %s5621_s16, %s5621_s16 }
 0xae5   :  { %5494 = vmatprep.subr.mxu1 %v5643_v1  ;;  %5504 = vmatprep.mubr.msk.f32.mxu1 %vm5644_vm4, %v5643_v1 }
 0xae6   :  { %5495 = vmatpush3.msra.mxu1 %v4831_v7  ;;  %5532 = vmatprep.mubr.msk.f32.mxu0 %vm5644_vm4, %v5643_v1  ;;  %p5628_p3 = por %p5627_p2, %p5626_p1 }
 0xae7   :  { %5496 = vmatprep.subr.mxu1 %v5643_v1  ;;  %5525 = vmatpush3.msra.mxu0 %v4842_v10 }
 0xae8   :  { %5497 = vmatpush3.msra.mxu1 %v4830_v8  ;;  %5526 = vmatprep.subr.mxu0 %v5643_v1  ;;  %p5629_p4 = pnand %p5628_p3, %p5622_p0 }
 0xae9   :  { %5498 = vmatprep.subr.mxu1 %v5643_v1  ;;  %5527 = vmatpush3.msra.mxu0 %v4841_v12 }
 0xaea   :  { %5499 = vmatpush3.msra.mxu1 %v4829_v9  ;;  %5528 = vmatprep.subr.mxu0 %v5643_v1 }
 0xaeb   :  { %5500 = vmatprep.subr.mxu1 %v5643_v1  ;;  %5529 = vmatpush3.msra.mxu0 %v4840_v14 }
 0xaec   :  { %5501 = vmatpush3.msra.mxu1 %v4828_v11  ;;  %5530 = vmatprep.subr.mxu0 %v5643_v1  ;;  %v4867_v11 = vld [vmem:[%s7453_s17] ss:$0 sm:$0xff] }
 0xaed   :  { %5502 = vmatprep.subr.mxu1 %v5643_v1  ;;  %5531 = vmatpush3.msra.mxu0 %v4839_v15 }
 0xaee   :  { %5503 = vmatpush3.msra.mxu1 %v4827_v13  ;;  %5563 = vmatprep.subr.mxu0 %v5643_v1 }
 0xaef   :  { %5535 = vmatprep.subr.mxu1 %v5643_v1 }
 0xb93   :  { %v3711_v16 = vpop.f32.mrf.mxu0 }
 0xb95   :  { %v5478_v17 = vpop.f32.mrf.mxu0 }
 0xb99   :  { %v3553_v18 = vpop.f32.mrf.mxu1  ;;  %v3945_v19 = vpop.f32.mrf.mxu0 }
 0xb9a   :  { %v3557_v20 = vadd.f32 %v3553_v18, %v7221_v43  ;;  %5533 = vmatmul.mubr.msk.f32.vlgmr.msra.gmra.mxu0 %vm2937_vm7, %v3945_v19  ;;  %v4367_v43 = vld [vmem:[%s7450_s14 + $0x10] sm:$0xff] }
 0xb9b   :  { %v5450_v21 = vpop.f32.mrf.mxu1  ;;  %v5515_v50 = vpop.f32.mrf.mxu0  ;;  %5565 = vmatprep.mubr.msk.f32.mxu0 %vm5644_vm4, %v5643_v1  ;;  %5564 = vmatpush3.msk.msra.mxu0 %vm4209_vm8, %v4204_v63 }
 0xb9c   :  { %v3715_v52 = vadd.f32 %v3711_v16, %v3557_v20  ;;  %5568 = vmatprep.subr.mxu0 %v5643_v1 }
 0xb9e   :  { %5566 = vmatmul.mubr.msk.f32.vlgmr.msra.gmra.mxu0 %vm4205_vm9, %v4203_v53 }
 0xb9f   :  { %v3787_v54 = vpop.f32.mrf.mxu1  ;;  %5576 = vmatprep.mubr.msk.f32.mxu0 %vm5644_vm4, %v5643_v1  ;;  %5569 = vmatpush3.msra.mxu0 %v4202_v55 }
 0xba0   :  { %5505 = vmatmul.mubr.msk.f32.vlgmr.msra.gmra.mxu1 %vm2937_vm7, %v3787_v54  ;;  %5570 = vmatprep.subr.mxu0 %v5643_v1 }
 0xba1   :  { %5536 = vmatpush3.msk.msra.mxu1 %vm102_vm0, %v6944_v28  ;;  %5541 = vmatprep.mubr.msk.f32.mxu1 %vm5644_vm4, %v5643_v1  ;;  %v5487_v56 = vpop.f32.mrf.mxu1  ;;  %v4857_v28 = vld [vmem:[%s7445_s9 + $0x230] sm:$0xff] }
 0xba2   :  { %5537 = vmatprep.subr.mxu1 %v5643_v1  ;;  %5571 = vmatpush3.msra.mxu0 %v4201_v30 }
 0xba3   :  { %5538 = vmatpush3.msra.mxu1 %v6946_v31  ;;  %v4856_v31 = vld [vmem:[%s7445_s9 + $0x228] sm:$0xff]  ;;  %5572 = vmatprep.subr.mxu0 %v5643_v1 }
 0xba4   :  { %5539 = vmatprep.subr.mxu1 %v5643_v1  ;;  %5573 = vmatpush3.msra.mxu0 %v4200_v33 }
 0xba5   :  { %5540 = vmatpush3.msra.mxu1 %v6951_v32  ;;  %v4855_v32 = vld [vmem:[%s7445_s9 + $0x220] sm:$0xff]  ;;  %5574 = vmatprep.subr.mxu0 %v5643_v1 }
 0xba6   :  { %5542 = vmatmul.mubr.msk.f32.vlgmr.msra.gmra.mxu1 %vm2768_vm6, %v4848_v57  ;;  %5544 = vmatprep.subr.mxu1 %v5643_v1 }
 0xba7   :  { %5545 = vmatpush3.msra.mxu1 %v4858_v58  ;;  %5560 = vmatprep.mubr.msk.f32.mxu1 %vm5644_vm4, %v5643_v1 }
 0xba8   :  { %5546 = vmatprep.subr.mxu1 %v5643_v1  ;;  %5575 = vmatpush3.msra.mxu0 %v4199_v25 }
 0xba9   :  { %5547 = vmatpush3.msra.mxu1 %v4857_v28  ;;  %5579 = vmatprep.subr.mxu0 %v5643_v1 }
 0xbaa   :  { %5548 = vmatprep.subr.mxu1 %v5643_v1 }
 0xbab   :  { %5549 = vmatpush3.msra.mxu1 %v4856_v31 }
 0xbac   :  { %5550 = vmatprep.subr.mxu1 %v5643_v1 }
 0xbad   :  { %5551 = vmatpush3.msra.mxu1 %v4855_v32 }
 0xbae   :  { %5552 = vmatprep.subr.mxu1 %v5643_v1 }
 0xbaf   :  { %5553 = vmatpush3.msra.mxu1 %v4854_v59 }
 0xbb0   :  { %5554 = vmatprep.subr.mxu1 %v5643_v1 }
 0xbb1   :  { %5555 = vmatpush3.msra.mxu1 %v4853_v60 }
 0xbb2   :  { %5556 = vmatprep.subr.mxu1 %v5643_v1 }
 0xbb3   :  { %5557 = vmatpush3.msra.mxu1 %v4852_v61 }
 0xbb4   :  { %5558 = vmatprep.subr.mxu1 %v5643_v1 }
 0xbb5   :  { %5559 = vmatpush3.msra.mxu1 %v4851_v62 }
 0xbb6   :  { %5590 = vmatprep.subr.mxu1 %v5643_v1 }
 0xc5a   :  { %v4027_v22 = vpop.f32.mrf.mxu0 }
 0xc5c   :  { %v5534_v23 = vpop.f32.mrf.mxu0 }
 0xc5e   :  { %v4279_v40 = vpop.f32.mrf.mxu0 }
 0xc60   :  { %v3869_v24 = vpop.f32.mrf.mxu1  ;;  %v5567_v41 = vpop.f32.mrf.mxu0 }
 0xc61   :  { %v3873_v26 = vadd.f32 %v3869_v24, %v3715_v52 }
 0xc62   :  { %v5506_v49 = vpop.f32.mrf.mxu1 }
 0xc63   :  { %v4031_v27 = vadd.f32 %v4027_v22, %v3873_v26 }
 0xc66   :  { %v4103_v29 = vpop.f32.mrf.mxu1 }
 0xc67   :  { %5561 = vmatmul.mubr.msk.f32.vlgmr.msra.gmra.mxu1 %vm2937_vm7, %v4103_v29 }
 0xc68   :  { %v5543_v51 = vpop.f32.mrf.mxu1  ;;  %5594 = vmatprep.mubr.msk.f32.mxu1 %vm5644_vm4, %v5643_v1  ;;  %5591 = vmatpush3.msk.msra.mxu1 %vm4209_vm8, %v4451_v4 }
 0xc69   :  { %5592 = vmatprep.subr.mxu1 %v5643_v1 }
 0xc6a   :  { %5593 = vmatpush3.msra.mxu1 %v4450_v5 }
 0xd27   :  { %v4185_v34 = vpop.f32.mrf.mxu1 }
 0xd28   :  { %v4189_v36 = vadd.f32 %v4185_v34, %v4031_v27 }
 0xd29   :  { %v5562_v37 = vpop.f32.mrf.mxu1 }
 0xd2a   :  { %v4197_v38 = vadd.f32 %v4860_v35, %v4189_v36 }
 0xd2c   :  { %v4198_v39 = vmax.f32 %v4197_v38, 0.0 }
 0xd2e   :  { %5577 = vmatmul.mubr.msk.f32.vlgmr.msra.gmra.mxu0 %vm2004_vm5, %v4198_v39 }
 0xd2f   :  { %5587 = vmatprep.mubr.msk.f32.mxu0 %vm5644_vm4, %v5643_v1  ;;  %5580 = vmatpush3.msra.mxu0 %v4368_v42 }
 0xd30   :  { %5581 = vmatprep.subr.mxu0 %v5643_v1 }
 0xd31   :  { %5582 = vmatpush3.msra.mxu0 %v4367_v43 }
 0xd32   :  { %5583 = vmatprep.subr.mxu0 %v5643_v1 }
 0xd33   :  { %5584 = vmatpush3.msra.mxu0 %v4366_v44 }
 0xd34   :  { %5585 = vmatprep.subr.mxu0 %v5643_v1 }
 0xd35   :  { %5586 = vmatpush3.msra.mxu0 %v4365_v45 }
 0xdee   :  { %v4352_v46 = vpop.f32.mrf.mxu0 }
 0xdef   :  { %v4353_v0 = vadd.f32 %v4352_v46, %v4279_v40 }
 0xdf0   :  { %v5578_v48 = vpop.f32.mrf.mxu0 }
 0xdf1   :  { %v4363_v2 = vadd.f32 %v4864_v47, %v4353_v0 }
 0xdf3   :  { %v4364_v3 = vmax.f32 %v4363_v2, 0.0 }
 0xdf5   :  { %5588 = vmatmul.mubr.msk.f32.vlgmr.msra.gmra.mxu0 %vm2004_vm5, %v4364_v3 }
 0xeb5   :  { %v4445_v7 = vpop.f32.mrf.mxu0 }
 0xeb6   :  { %v4446_v8 = vadd.f32 %v4865_v6, %v4445_v7 }
 0xeb7   :  { %v5589_v9 = vpop.f32.mrf.mxu0 }
 0xeb8   :  { %v4449_v10 = vmax.f32 %v4446_v8, 0.0 }
 0xeba   :  { %5595 = vmatmul.mubr.msk.f32.vlgmr.msra.gmra.mxu1 %vm4459_vm10, %v4449_v10 }
 0xf7a   :  { %v4532_v1 = vpop.f32.mrf.mxu1 }
 0xf7b   :  { %v4533_v12 = vadd.f32 %v4867_v11, %v4532_v1 }
 0xf7c   :  { %v5596_v13 = vpop.f32.mrf.mxu1 }
 0xf7d   :  { %4537 = vst.msk [vmem:[#allocation2] sm:$0x3] %vm4536_vm11, %v4533_v12 }
 0xf7e   :  { %5632 = shalt.err (!%p5629_p4)
}
 0xf7f   :  { %4547 = dma.vmem_to_hbm [thread:$0]  %s4545_s0, 32, %s7454_s18, [#allocation3]  }
 0xf80   :  { %5641 = dma.done.wait [#allocation3], 32  }
 0xf81   :  { %5642 = vsyncadd [#allocation3], 4294967264 }
 0xf82   :  { %4551 = vsyncpa [#allocation3], 1 }

</bundles_post_ra>
